<compile_context>
chip_gen: v6e
topology: v6e:2x2x1
jax: 0.10.0
libtpu: 0.0.40
codegen_flags: <defaults>
</compile_context>

<pallas_src>
import functools

import jax
import jax.numpy as jnp
from jax.experimental import pallas as pl
from jax.experimental.pallas import tpu as pltpu

# dot_general dimension numbers: contract the LAST dim of both operands (A @ B^T).
NT_DIMS = (((1,), (1,)), ((), ()))
LANE = 256          # pad V / E to MXU-friendly multiples (256x256 MXU on v6e/v7x, 2x128 on v5e)


def _rup(x, m):
    return (x + m - 1) // m * m


def _row_layout(hid, out_c):
    """Padded row counts so every hot slice is sublane-tile aligned."""
    GRp = _rup(hid + 1, 16)        # g-block rows: theta_vertex + ones rider (bf16 tile)
    YR = _rup(hid + 1, 16)         # theta_e2v rows + deg_v rider
    ZR = _rup(out_c + 2, 16)       # layer-2 rows: theta + ones rider + deg_v row
    R1 = _rup(hid + GRp + 1, 8)    # fused layer-1 output rows: x_init | g-block | score
    return GRp, YR, ZR, R1


def _elu(x):
    # ELU(alpha=1): x if x > 0 else exp(x) - 1  (clamp exp arg, both where-branches evaluated)
    return jnp.where(x > 0, x, jnp.exp(jnp.minimum(x, 0.0)) - 1.0)


# ------------------------------- fused kernel -----------------------------------
def dphgnn_kernel(xt_ref, h_ref, st_ref,
                  w1_ref, b1_ref,
                  wea_ref, web_ref, be_ref,
                  wt_ref, bt_ref,
                  out_ref,
                  g_sc, xi_sc, m1_sc, z_sc, xo_sc):
    f32, bf16 = jnp.float32, jnp.bfloat16
    hid = xi_sc.shape[0]
    GRp = g_sc.shape[0]
    out_c = out_ref.shape[0]

    phase = pl.program_id(0)          # 0: layer-1 E pass, 1: layer-2 E pass
    et = pl.program_id(1)
    n_et = pl.num_programs(1)
    Hb = h_ref[...]                   # (Vp, TE) bf16 0/1 incidence tile

    # -------- phase 0, first tile: vertex-side fused linear of layer 1 ----------
    @pl.when((phase == 0) & (et == 0))
    def _():
        # rows: [theta_x | theta_vertex | ones | pad | atten-score | pad]  (pre-fused, pre-padded)
        ft = jnp.dot(w1_ref[...], xt_ref[...], preferred_element_type=f32) + b1_ref[...]
        xi_sc[...] = ft[0:hid, :]                               # theta_x(X)^T residual
        score = ft[hid + GRp:hid + GRp + 1, :]                  # atten_vertex(theta_vertex(X))^T
        w = jnp.where(score >= 0, score, 0.2 * score)           # LeakyReLU(0.2); atten_dropout = id (eval)
        # Global-max-shifted softmax: identical to the per-edge sparse softmax (the shift
        # cancels exactly in the numerator/denominator ratio), no (V,E) temporaries.
        # TODO(synk): per-edge max would be more robust if attention scores span a huge range.
        m = jnp.max(w, axis=1, keepdims=True)
        expw = jnp.exp(w - m)
        # g rows: [exp(w)*theta_vertex(X) | exp(w) (denominator rider) | zeros]
        g_sc[...] = (expw * ft[hid:hid + GRp, :]).astype(bf16)
        m1_sc[...] = jnp.zeros_like(m1_sc)

    # -------- phase 0, every tile: v2e softmax-sum, theta_e2v, e2v accumulate ----
    @pl.when(phase == 0)
    def _():
        agg = jnp.dot(g_sc[...], Hb, preferred_element_type=f32)      # (GRp, TE): numer | denom
        denom = agg[hid:hid + 1, :]
        inv_den = jnp.where(denom > 0, pl.reciprocal(denom, approx=True), 0.0)
        y_v2e = _elu(agg[0:hid, :] * inv_den).astype(bf16)            # ELU(Y_v2e)^T, (hid, TE)
        # theta_e2v(cat([Y_v2e, S], 1)) as a split bf16 matmul; ones row (deg_v rider)
        # is folded into the padded bias, so no concatenate.
        y_aug = (jnp.dot(wea_ref[...], y_v2e, preferred_element_type=f32)
                 + jnp.dot(web_ref[...], st_ref[...], preferred_element_type=f32)
                 + be_ref[...]).astype(bf16)                          # (YR, TE)
        # e2v accumulate: m1 += (H_tile @ [Y | 1])^T   (rhs-transposed MXU form, no H^T copy)
        m1_sc[...] += jax.lax.dot_general(y_aug, Hb, NT_DIMS, preferred_element_type=f32)

    # -------- phase 0, last tile: finalize layer 1, build layer-2 LHS ------------
    @pl.when((phase == 0) & (et == n_et - 1))
    def _():
        deg_v = m1_sc[hid:hid + 1, :]                                 # (1, Vp)
        inv_dv = jnp.where(deg_v > 0, pl.reciprocal(deg_v, approx=True), 0.0)
        # e2v 'mean' -> ELU -> dropout(identity, eval) -> residual with theta_x(X)
        x1 = _elu(m1_sc[0:hid, :] * inv_dv) + xi_sc[...]              # (hid, Vp)
        # layer-2 theta with folded ones row (deg_e rider)
        x2 = jnp.dot(wt_ref[...], x1.astype(bf16), preferred_element_type=f32) + bt_ref[...]
        z_sc[...] = x2.astype(bf16)                                   # rows: theta(x1) | 1 | . | 0
        # deg_v rider row; bf16 is exact for degrees up to 256 (f32 accumulation downstream)
        z_sc[out_c + 1:out_c + 2, :] = deg_v.astype(bf16)
        xo_sc[...] = jnp.zeros_like(xo_sc)

    # -------- phase 1, every tile: layer-2 v2e mean, De^-1/2 scale, e2v sum ------
    @pl.when(phase == 1)
    def _():
        m2 = jnp.dot(z_sc[...], Hb, preferred_element_type=f32)       # (ZR, TE): H^T x2 | deg_e | sum(deg_v)
        htx = m2[0:out_c, :]
        deg_e = m2[out_c:out_c + 1, :]
        sum_dv = m2[out_c + 1:out_c + 2, :]
        inv_de = jnp.where(deg_e > 0, pl.reciprocal(deg_e, approx=True), 0.0)
        # _De = scatter-mean of deg_v onto edges with include_self=True -> sum / (deg_e + 1); inf -> 1
        de_mean = sum_dv * pl.reciprocal(deg_e + 1.0, approx=True)
        inv_sqrt_de = jnp.where(de_mean > 0, jax.lax.rsqrt(de_mean), 1.0)
        y2 = ((inv_de * inv_sqrt_de) * htx).astype(bf16)              # (out_c, TE)
        xo_sc[...] += jax.lax.dot_general(y2, Hb, NT_DIMS, preferred_element_type=f32)

    # -------- phase 1, last tile: final D_v^{-1/2} scaling (is_last -> no act/drop)
    @pl.when((phase == 1) & (et == n_et - 1))
    def _():
        deg_v = m1_sc[hid:hid + 1, :]
        inv_sqrt_dv = jnp.where(deg_v > 0, jax.lax.rsqrt(deg_v), 0.0)
        out_ref[...] = inv_sqrt_dv * xo_sc[...]


# --------------------------------- wrapper --------------------------------------
def _vmem_budget():
    """~100 MiB on 128-MiB parts (v5e/v6e), ~54 MiB on v7x (64 MiB physical)."""
    try:
        cap = int(pltpu.get_tpu_info().vmem_capacity_bytes)
    except Exception:
        cap = 64 * 1024 * 1024
    return max(min(100 * 1024 * 1024, int(cap * 0.85)), 32 * 1024 * 1024)


@functools.partial(jax.jit, static_argnames=("out_c",))
def dphgnn_forward(X, H, S, kp, *, out_c):
    """X: (num_v, in_c) f32, H: (num_v, num_e) 0/1, S: (num_e, 74 - hid) f32."""
    f32, bf16 = jnp.float32, jnp.bfloat16
    num_v, in_c = X.shape
    num_e = H.shape[1]
    s_dim = S.shape[1]
    hid = kp["we2v_a"].shape[1]
    GRp, YR, ZR, _ = _row_layout(hid, out_c)

    budget = _vmem_budget()
    Vp = _rup(num_v, LANE)

    # --- pick the largest edge tile that keeps double-buffered H + scratch in VMEM ---
    per_v = (GRp * 2 + hid * 4 + YR * 4 + ZR * 2 + out_c * 4          # persistent scratch
             + 2 * (in_c * 2 + out_c * 4))                             # resident X^T + output buffers
    fixed = per_v * Vp + (2 << 20)                                     # + weights & slack
    avail = max(budget - fixed, 2 << 20)
    per_e = 4 * Vp + 4 * s_dim + 4 * (GRp + 2 * YR + 2 * ZR + 3 * out_c)  # H,S (2 bufs) + f32 temps
    TE = max((avail // per_e) // LANE * LANE, LANE)
    TE = min(TE, _rup(num_e, LANE))
    Ep = _rup(num_e, TE)
    n_et = Ep // TE
    # TODO(synk): V-tiling (and per-core partial E-accumulators for v7x megacore) once the
    # per-vertex scratch columns themselves no longer fit VMEM.

    # Zero padding of V/E is semantically safe: padded vertices/edges have zero incidence,
    # hence zero degrees, contribute nothing, and produce zero output rows (sliced off below).
    xt = jnp.zeros((in_c, Vp), bf16).at[:, :num_v].set(X.T.astype(bf16))
    hb = jnp.zeros((Vp, Ep), bf16).at[:num_v, :num_e].set(H.astype(bf16))
    # TODO(synk): store H as int8 / bit-packed in HBM and upcast per tile once graphs reach
    # the HBM-streaming regime (these passes are H-bandwidth bound).
    st = jnp.zeros((s_dim, Ep), bf16).at[:, :num_e].set(S.T.astype(bf16))

    def full(a):
        return pl.BlockSpec(a.shape, lambda p, e: (0, 0))

    out_t = pl.pallas_call(
        dphgnn_kernel,
        out_shape=jax.ShapeDtypeStruct((out_c, Vp), f32),
        grid=(2, n_et),                                   # (phase, edge-tile), both sequential
        in_specs=[
            full(xt),                                               # X^T, resident
            pl.BlockSpec((Vp, TE), lambda p, e: (0, e)),            # H tile, streamed per phase
            pl.BlockSpec((s_dim, TE), lambda p, e: (0, e * (1 - p))),  # S^T only streams in phase 0
            full(kp["w1"]), full(kp["b1"]),
            full(kp["we2v_a"]), full(kp["we2v_b"]), full(kp["be2v"]),
            full(kp["wt"]), full(kp["bt"]),
        ],
        out_specs=pl.BlockSpec((out_c, Vp), lambda p, e: (0, 0)),
        scratch_shapes=[
            pltpu.VMEM((GRp, Vp), bf16),     # exp(w) * [theta_vertex(X) ; 1]
            pltpu.VMEM((hid, Vp), f32),      # theta_x(X) residual
            pltpu.VMEM((YR, Vp), f32),       # layer-1 e2v accumulator [H@Y ; deg_v]
            pltpu.VMEM((ZR, Vp), bf16),      # layer-2 LHS [theta(x1) ; 1 ; deg_v]
            pltpu.VMEM((out_c, Vp), f32),    # layer-2 e2v accumulator
        ],
        compiler_params=pltpu.CompilerParams(
            dimension_semantics=("arbitrary", "arbitrary"),
            vmem_limit_bytes=budget),
    )(xt, hb, st, kp["w1"], kp["b1"], kp["we2v_a"], kp["we2v_b"], kp["be2v"],
      kp["wt"], kp["bt"])
    return out_t[:, :num_v].T                                      # back to (num_v, out_c)


# ---------------------------- parameters & reference -----------------------------
def init_raw_params(key, in_c, hid, out_c, s_dim):
    """torch.nn.Linear-style init, weights in (fan_out, fan_in) layout."""
    def lin(k, fan_in, fan_out, bias=True):
        kw, kb = jax.random.split(k)
        bound = 1.0 / float(fan_in) ** 0.5
        W = jax.random.uniform(kw, (fan_out, fan_in), jnp.float32, -bound, bound)
        b = (jax.random.uniform(kb, (fan_out,), jnp.float32, -bound, bound) if bias else None)
        return W, b
    ks = jax.random.split(key, 5)
    Wx, bx = lin(ks[0], in_c, hid)             # theta_x
    Wv, bv = lin(ks[1], in_c, hid)             # theta_vertex
    wa, _ = lin(ks[2], hid, 1, bias=False)     # atten_vertex (no bias)
    We2v, be2v = lin(ks[3], hid + s_dim, hid)  # theta_e2v (Linear(74, hid))
    Wt, bt = lin(ks[4], hid, out_c)            # HypergraphConv.theta
    # theta_v2e_group exists in the module but its output is never used (dead code) -> omitted
    return dict(Wx=Wx, bx=bx, Wv=Wv, bv=bv, wa=wa, We2v=We2v, be2v=be2v, Wt=Wt, bt=bt)


def fuse_params(rp, in_c, hid, out_c, s_dim):
    """Fold the 'ones' rider rows and the atten composition into padded, bf16 kernel weights."""
    GRp, YR, ZR, R1 = _row_layout(hid, out_c)
    bf = jnp.bfloat16

    w1 = jnp.zeros((R1, in_c), jnp.float32)
    b1 = jnp.zeros((R1, 1), jnp.float32)
    w1 = w1.at[0:hid].set(rp["Wx"])                        # theta_x
    b1 = b1.at[0:hid, 0].set(rp["bx"])
    w1 = w1.at[hid:2 * hid].set(rp["Wv"])                  # theta_vertex
    b1 = b1.at[hid:2 * hid, 0].set(rp["bv"])
    b1 = b1.at[2 * hid, 0].set(1.0)                        # ones rider -> softmax denominator
    w1 = w1.at[hid + GRp].set((rp["wa"] @ rp["Wv"])[0])    # atten_vertex o theta_vertex
    b1 = b1.at[hid + GRp, 0].set((rp["wa"] @ rp["bv"])[0])

    wea = jnp.zeros((YR, hid), jnp.float32).at[0:hid].set(rp["We2v"][:, :hid])
    web = jnp.zeros((YR, s_dim), jnp.float32).at[0:hid].set(rp["We2v"][:, hid:])
    be = jnp.zeros((YR, 1), jnp.float32).at[0:hid, 0].set(rp["be2v"])
    be = be.at[hid, 0].set(1.0)                            # ones rider -> deg_v

    wt = jnp.zeros((ZR, hid), jnp.float32).at[0:out_c].set(rp["Wt"])
    bt = jnp.zeros((ZR, 1), jnp.float32).at[0:out_c, 0].set(rp["bt"])
    bt = bt.at[out_c, 0].set(1.0)                          # ones rider -> deg_e

    return dict(w1=w1.astype(bf), b1=b1,
                we2v_a=wea.astype(bf), we2v_b=web.astype(bf), be2v=be,
                wt=wt.astype(bf), bt=bt)


def dphgnn_reference(X, H, S, rp):
    """Pure-JAX dense f32 reference of the PyTorch module (eval mode)."""
    elu = lambda x: jnp.where(x > 0, x, jnp.expm1(jnp.minimum(x, 0.0)))
    deg_v = H.sum(axis=1)
    deg_e = H.sum(axis=0)

    X_init = X @ rp["Wx"].T + rp["bx"]
    X_feat = X @ rp["Wv"].T + rp["bv"]
    score = (X_feat @ rp["wa"].T)[:, 0]
    w = jnp.where(score >= 0, score, 0.2 * score)            # LeakyReLU(0.2)
    mask = (H.T > 0)                                          # (E, V)
    m_e = jnp.max(jnp.where(mask, w[None, :], -jnp.inf), axis=1, keepdims=True)
    ex = jnp.where(mask, jnp.exp(w[None, :] - m_e), 0.0)
    p = ex / jnp.maximum(ex.sum(axis=1, keepdims=True), 1e-30)
    Y_v2e = elu(p @ X_feat)                                   # (E, hid)
    msg = jnp.concatenate([Y_v2e, S], axis=1)
    Y = msg @ rp["We2v"].T + rp["be2v"]                       # (E, hid)
    safe_dv = jnp.where(deg_v > 0, deg_v, 1.0)
    x1 = elu((H @ Y) / safe_dv[:, None] * (deg_v > 0)[:, None]) + X_init
    # layer 2 (HypergraphConv, is_last=True)
    x2 = x1 @ rp["Wt"].T + rp["bt"]
    safe_de = jnp.where(deg_e > 0, deg_e, 1.0)
    Yl2 = (H.T @ x2) / safe_de[:, None] * (deg_e > 0)[:, None]
    de_mean = (H.T @ deg_v) / (deg_e + 1.0)                   # scatter-mean, include_self=True
    De = jnp.where(de_mean > 0, de_mean ** -0.5, 1.0)
    Y2 = De[:, None] * Yl2
    xo = H @ Y2
    dv_is = jnp.where(deg_v > 0, deg_v ** -0.5, 0.0)
    return dv_is[:, None] * xo


if __name__ == "__main__":
    key = jax.random.PRNGKey(0)
    in_c, hid, out_c = 10, 32, 4
    num_v, num_e = 24, 16
    s_dim = 74 - hid        # theta_e2v is Linear(74, hid): msg = cat([Y_v2e(hid), S_features])

    kx, ks_, kh, kp = jax.random.split(key, 4)
    X = jax.random.normal(kx, (num_v, in_c), jnp.float32)
    S = jax.random.normal(ks_, (num_e, s_dim), jnp.float32)

    # synthetic 0/1 incidence matrix (every edge non-empty, every vertex covered)
    H = (jax.random.uniform(kh, (num_v, num_e)) < 0.35).astype(jnp.float32)
    H = H.at[jnp.arange(num_e) % num_v, jnp.arange(num_e)].set(1.0)
    H = H.at[jnp.arange(num_v), jnp.arange(num_v) % num_e].set(1.0)

    raw = init_raw_params(kp, in_c, hid, out_c, s_dim)
    fused = fuse_params(raw, in_c, hid, out_c, s_dim)

    out = dphgnn_forward(X, H, S, fused, out_c=out_c)
    jax.block_until_ready(out)

    assert out.shape == (num_v, out_c) and out.dtype == jnp.float32
    assert bool(jnp.all(jnp.isfinite(out)))

    ref = dphgnn_reference(X, H, S, raw)
    err = float(jnp.max(jnp.abs(out - ref)))
    scale = float(jnp.max(jnp.abs(ref))) + 1e-6
    assert err <= 0.05 * scale + 0.02, f"kernel/reference mismatch: max abs err {err}"
    print("KERNEL_OK")
</pallas_src>

<mosaic_0001>
module attributes {stable_mosaic.version = 11 : i64} {
  func.func @dphgnn_kernel(%arg0: i32, %arg1: i32, %arg2: memref<10x256xbf16, #tpu.memory_space<vmem>>, %arg3: memref<256x256xbf16, #tpu.memory_space<vmem>>, %arg4: memref<42x256xbf16, #tpu.memory_space<vmem>>, %arg5: memref<88x10xbf16, #tpu.memory_space<vmem>>, %arg6: memref<88x1xf32, #tpu.memory_space<vmem>>, %arg7: memref<48x32xbf16, #tpu.memory_space<vmem>>, %arg8: memref<48x42xbf16, #tpu.memory_space<vmem>>, %arg9: memref<48x1xf32, #tpu.memory_space<vmem>>, %arg10: memref<16x32xbf16, #tpu.memory_space<vmem>>, %arg11: memref<16x1xf32, #tpu.memory_space<vmem>>, %arg12: memref<4x256xf32, #tpu.memory_space<vmem>>, %arg13: memref<48x256xbf16, #tpu.memory_space<vmem>>, %arg14: memref<32x256xf32, #tpu.memory_space<vmem>>, %arg15: memref<48x256xf32, #tpu.memory_space<vmem>>, %arg16: memref<16x256xbf16, #tpu.memory_space<vmem>>, %arg17: memref<4x256xf32, #tpu.memory_space<vmem>>) attributes {dimension_semantics = [#tpu.dimension_semantics<arbitrary>, #tpu.dimension_semantics<arbitrary>], iteration_bounds = array<i64: 2, 1>, scalar_prefetch = 0 : i64, scratch_operands = 5 : i64, tpu.core_type = #tpu.core_type<tc>, window_params = [{pipeline_mode = #tpu.pipeline_mode<synchronous>, transform_indices = @transform_0, window_bounds = array<i64: 10, 256>}, {transform_indices = @transform_1, window_bounds = array<i64: 256, 256>}, {transform_indices = @transform_2, window_bounds = array<i64: 42, 256>}, {pipeline_mode = #tpu.pipeline_mode<synchronous>, transform_indices = @transform_3, window_bounds = array<i64: 88, 10>}, {pipeline_mode = #tpu.pipeline_mode<synchronous>, transform_indices = @transform_4, window_bounds = array<i64: 88, 1>}, {pipeline_mode = #tpu.pipeline_mode<synchronous>, transform_indices = @transform_5, window_bounds = array<i64: 48, 32>}, {pipeline_mode = #tpu.pipeline_mode<synchronous>, transform_indices = @transform_6, window_bounds = array<i64: 48, 42>}, {pipeline_mode = #tpu.pipeline_mode<synchronous>, transform_indices = @transform_7, window_bounds = array<i64: 48, 1>}, {pipeline_mode = #tpu.pipeline_mode<synchronous>, transform_indices = @transform_8, window_bounds = array<i64: 16, 32>}, {pipeline_mode = #tpu.pipeline_mode<synchronous>, transform_indices = @transform_9, window_bounds = array<i64: 16, 1>}, {pipeline_mode = #tpu.pipeline_mode<synchronous>, transform_indices = @transform_10, window_bounds = array<i64: 4, 256>}]} {
    %c0 = arith.constant 0 : index
    %c0_0 = arith.constant 0 : index
    %0 = vector.load %arg3[%c0, %c0_0] : memref<256x256xbf16, #tpu.memory_space<vmem>>, vector<256x256xbf16>
    %c0_i32 = arith.constant 0 : i32
    %1 = arith.cmpi eq, %arg0, %c0_i32 : i32
    %c0_i32_1 = arith.constant 0 : i32
    %2 = arith.cmpi eq, %arg1, %c0_i32_1 : i32
    %3 = arith.andi %1, %2 : i1
    %4 = arith.extui %3 : i1 to i32
    %c0_i32_2 = arith.constant 0 : i32
    %5 = arith.cmpi ne, %4, %c0_i32_2 : i32
    scf.if %5 {
      %c0_12 = arith.constant 0 : index
      %c0_13 = arith.constant 0 : index
      %22 = vector.load %arg5[%c0_12, %c0_13] : memref<88x10xbf16, #tpu.memory_space<vmem>>, vector<88x10xbf16>
      %c0_14 = arith.constant 0 : index
      %c0_15 = arith.constant 0 : index
      %23 = vector.load %arg2[%c0_14, %c0_15] : memref<10x256xbf16, #tpu.memory_space<vmem>>, vector<10x256xbf16>
      %cst = arith.constant dense<0.000000e+00> : vector<88x256xf32>
      %24 = tpu.matmul %22, %23, %cst {dimension_numbers = #tpu.dot_dimension_numbers<[1], [0], [0], [1], [0, 0, 1, 1], [], []>} : vector<88x10xbf16>, vector<10x256xbf16>, vector<88x256xf32> -> vector<88x256xf32>
      %c0_16 = arith.constant 0 : index
      %c0_17 = arith.constant 0 : index
      %25 = vector.load %arg6[%c0_16, %c0_17] : memref<88x1xf32, #tpu.memory_space<vmem>>, vector<88x1xf32>
      %26 = vector.broadcast %25 : vector<88x1xf32> to vector<88x256xf32>
      %27 = arith.addf %24, %26 : vector<88x256xf32>
      %28 = vector.extract_strided_slice %27 {offsets = [0, 0], sizes = [32, 256], strides = [1, 1]} : vector<88x256xf32> to vector<32x256xf32>
      %c0_18 = arith.constant 0 : index
      %c0_19 = arith.constant 0 : index
      %29 = vector.load %arg14[%c0_18, %c0_19] : memref<32x256xf32, #tpu.memory_space<vmem>>, vector<32x256xf32>
      tpu.vector_store %arg14[%c0_18, %c0_19], %28 {strides = array<i32>} : memref<32x256xf32, #tpu.memory_space<vmem>>, vector<32x256xf32>,
      %30 = vector.extract_strided_slice %27 {offsets = [80, 0], sizes = [1, 256], strides = [1, 1]} : vector<88x256xf32> to vector<1x256xf32>
      %cst_20 = arith.constant 0.000000e+00 : f32
      %31 = vector.broadcast %cst_20 : f32 to vector<1x256xf32>
      %32 = arith.cmpf oge, %30, %31 : vector<1x256xf32>
      %cst_21 = arith.constant 2.000000e-01 : f32
      %33 = vector.broadcast %cst_21 : f32 to vector<1x256xf32>
      %34 = arith.mulf %33, %30 : vector<1x256xf32>
      %35 = arith.select %32, %30, %34 : vector<1x256xi1>, vector<1x256xf32>
      %cst_22 = arith.constant dense<0xFF800000> : vector<1xf32>
      %36 = vector.multi_reduction <maximumf>, %35, %cst_22 [1] : vector<1x256xf32> to vector<1xf32>
      %37 = vector.shape_cast %36 : vector<1xf32> to vector<1x1xf32>
      %38 = vector.broadcast %37 : vector<1x1xf32> to vector<1x256xf32>
      %39 = arith.subf %35, %38 : vector<1x256xf32>
      %40 = math.exp %39 : vector<1x256xf32>
      %41 = vector.extract_strided_slice %27 {offsets = [32, 0], sizes = [48, 256], strides = [1, 1]} : vector<88x256xf32> to vector<48x256xf32>
      %42 = vector.broadcast %40 : vector<1x256xf32> to vector<48x256xf32>
      %43 = arith.mulf %42, %41 : vector<48x256xf32>
      %44 = arith.truncf %43 : vector<48x256xf32> to vector<48x256xbf16>
      %c0_23 = arith.constant 0 : index
      %c0_24 = arith.constant 0 : index
      %45 = vector.load %arg13[%c0_23, %c0_24] : memref<48x256xbf16, #tpu.memory_space<vmem>>, vector<48x256xbf16>
      tpu.vector_store %arg13[%c0_23, %c0_24], %44 {strides = array<i32>} : memref<48x256xbf16, #tpu.memory_space<vmem>>, vector<48x256xbf16>,
      %cst_25 = arith.constant 0.000000e+00 : f32
      %46 = vector.broadcast %cst_25 : f32 to vector<48x256xf32>
      %c0_26 = arith.constant 0 : index
      %c0_27 = arith.constant 0 : index
      %47 = vector.load %arg15[%c0_26, %c0_27] : memref<48x256xf32, #tpu.memory_space<vmem>>, vector<48x256xf32>
      tpu.vector_store %arg15[%c0_26, %c0_27], %46 {strides = array<i32>} : memref<48x256xf32, #tpu.memory_space<vmem>>, vector<48x256xf32>,
    } else {
    }
    %c0_i32_3 = arith.constant 0 : i32
    %6 = arith.cmpi eq, %arg0, %c0_i32_3 : i32
    %7 = arith.extui %6 : i1 to i32
    %c0_i32_4 = arith.constant 0 : i32
    %8 = arith.cmpi ne, %7, %c0_i32_4 : i32
    scf.if %8 {
      %c0_12 = arith.constant 0 : index
      %c0_13 = arith.constant 0 : index
      %22 = vector.load %arg13[%c0_12, %c0_13] : memref<48x256xbf16, #tpu.memory_space<vmem>>, vector<48x256xbf16>
      %cst = arith.constant dense<0.000000e+00> : vector<48x256xf32>
      %23 = tpu.matmul %22, %0, %cst {dimension_numbers = #tpu.dot_dimension_numbers<[1], [0], [0], [1], [0, 0, 1, 1], [], []>} : vector<48x256xbf16>, vector<256x256xbf16>, vector<48x256xf32> -> vector<48x256xf32>
      %24 = vector.extract_strided_slice %23 {offsets = [32, 0], sizes = [1, 256], strides = [1, 1]} : vector<48x256xf32> to vector<1x256xf32>
      %cst_14 = arith.constant 0.000000e+00 : f32
      %25 = vector.broadcast %cst_14 : f32 to vector<1x256xf32>
      %26 = arith.cmpf ogt, %24, %25 : vector<1x256xf32>
      %27 = tpu.reciprocal %24 {approx = true} : vector<1x256xf32> -> vector<1x256xf32>
      %cst_15 = arith.constant 0.000000e+00 : f32
      %28 = vector.broadcast %cst_15 : f32 to vector<1x256xf32>
      %29 = arith.select %26, %27, %28 : vector<1x256xi1>, vector<1x256xf32>
      %30 = vector.extract_strided_slice %23 {offsets = [0, 0], sizes = [32, 256], strides = [1, 1]} : vector<48x256xf32> to vector<32x256xf32>
      %31 = vector.broadcast %29 : vector<1x256xf32> to vector<32x256xf32>
      %32 = arith.mulf %30, %31 : vector<32x256xf32>
      %cst_16 = arith.constant 0.000000e+00 : f32
      %33 = vector.broadcast %cst_16 : f32 to vector<32x256xf32>
      %34 = arith.cmpf ogt, %32, %33 : vector<32x256xf32>
      %cst_17 = arith.constant 0.000000e+00 : f32
      %35 = vector.broadcast %cst_17 : f32 to vector<32x256xf32>
      %36 = arith.minimumf %32, %35 : vector<32x256xf32>
      %37 = math.exp %36 : vector<32x256xf32>
      %cst_18 = arith.constant 1.000000e+00 : f32
      %38 = vector.broadcast %cst_18 : f32 to vector<32x256xf32>
      %39 = arith.subf %37, %38 : vector<32x256xf32>
      %40 = arith.select %34, %32, %39 : vector<32x256xi1>, vector<32x256xf32>
      %41 = arith.truncf %40 : vector<32x256xf32> to vector<32x256xbf16>
      %c0_19 = arith.constant 0 : index
      %c0_20 = arith.constant 0 : index
      %42 = vector.load %arg7[%c0_19, %c0_20] : memref<48x32xbf16, #tpu.memory_space<vmem>>, vector<48x32xbf16>
      %cst_21 = arith.constant dense<0.000000e+00> : vector<48x256xf32>
      %43 = tpu.matmul %42, %41, %cst_21 {dimension_numbers = #tpu.dot_dimension_numbers<[1], [0], [0], [1], [0, 0, 1, 1], [], []>} : vector<48x32xbf16>, vector<32x256xbf16>, vector<48x256xf32> -> vector<48x256xf32>
      %c0_22 = arith.constant 0 : index
      %c0_23 = arith.constant 0 : index
      %44 = vector.load %arg8[%c0_22, %c0_23] : memref<48x42xbf16, #tpu.memory_space<vmem>>, vector<48x42xbf16>
      %c0_24 = arith.constant 0 : index
      %c0_25 = arith.constant 0 : index
      %45 = vector.load %arg4[%c0_24, %c0_25] : memref<42x256xbf16, #tpu.memory_space<vmem>>, vector<42x256xbf16>
      %cst_26 = arith.constant dense<0.000000e+00> : vector<48x256xf32>
      %46 = tpu.matmul %44, %45, %cst_26 {dimension_numbers = #tpu.dot_dimension_numbers<[1], [0], [0], [1], [0, 0, 1, 1], [], []>} : vector<48x42xbf16>, vector<42x256xbf16>, vector<48x256xf32> -> vector<48x256xf32>
      %47 = arith.addf %43, %46 : vector<48x256xf32>
      %c0_27 = arith.constant 0 : index
      %c0_28 = arith.constant 0 : index
      %48 = vector.load %arg9[%c0_27, %c0_28] : memref<48x1xf32, #tpu.memory_space<vmem>>, vector<48x1xf32>
      %49 = vector.broadcast %48 : vector<48x1xf32> to vector<48x256xf32>
      %50 = arith.addf %47, %49 : vector<48x256xf32>
      %51 = arith.truncf %50 : vector<48x256xf32> to vector<48x256xbf16>
      %c0_29 = arith.constant 0 : index
      %c0_30 = arith.constant 0 : index
      %52 = vector.load %arg15[%c0_29, %c0_30] : memref<48x256xf32, #tpu.memory_space<vmem>>, vector<48x256xf32>
      %cst_31 = arith.constant dense<0.000000e+00> : vector<48x256xf32>
      %53 = tpu.matmul %51, %0, %cst_31 {dimension_numbers = #tpu.dot_dimension_numbers<[1], [1], [0], [0], [0, 0, 1, 0], [], []>} : vector<48x256xbf16>, vector<256x256xbf16>, vector<48x256xf32> -> vector<48x256xf32>
      %54 = arith.addf %52, %53 : vector<48x256xf32>
      %c0_32 = arith.constant 0 : index
      %c0_33 = arith.constant 0 : index
      %55 = vector.load %arg15[%c0_32, %c0_33] : memref<48x256xf32, #tpu.memory_space<vmem>>, vector<48x256xf32>
      tpu.vector_store %arg15[%c0_32, %c0_33], %54 {strides = array<i32>} : memref<48x256xf32, #tpu.memory_space<vmem>>, vector<48x256xf32>,
    } else {
    }
    %c0_i32_5 = arith.constant 0 : i32
    %9 = arith.cmpi eq, %arg0, %c0_i32_5 : i32
    %c0_i32_6 = arith.constant 0 : i32
    %10 = arith.cmpi eq, %arg1, %c0_i32_6 : i32
    %11 = arith.andi %9, %10 : i1
    %12 = arith.extui %11 : i1 to i32
    %c0_i32_7 = arith.constant 0 : i32
    %13 = arith.cmpi ne, %12, %c0_i32_7 : i32
    scf.if %13 {
      %c32 = arith.constant 32 : index
      %c0_12 = arith.constant 0 : index
      %22 = vector.load %arg15[%c32, %c0_12] : memref<48x256xf32, #tpu.memory_space<vmem>>, vector<1x256xf32>
      %cst = arith.constant 0.000000e+00 : f32
      %23 = vector.broadcast %cst : f32 to vector<1x256xf32>
      %24 = arith.cmpf ogt, %22, %23 : vector<1x256xf32>
      %25 = tpu.reciprocal %22 {approx = true} : vector<1x256xf32> -> vector<1x256xf32>
      %cst_13 = arith.constant 0.000000e+00 : f32
      %26 = vector.broadcast %cst_13 : f32 to vector<1x256xf32>
      %27 = arith.select %24, %25, %26 : vector<1x256xi1>, vector<1x256xf32>
      %c0_14 = arith.constant 0 : index
      %c0_15 = arith.constant 0 : index
      %28 = vector.load %arg15[%c0_14, %c0_15] : memref<48x256xf32, #tpu.memory_space<vmem>>, vector<32x256xf32>
      %29 = vector.broadcast %27 : vector<1x256xf32> to vector<32x256xf32>
      %30 = arith.mulf %28, %29 : vector<32x256xf32>
      %cst_16 = arith.constant 0.000000e+00 : f32
      %31 = vector.broadcast %cst_16 : f32 to vector<32x256xf32>
      %32 = arith.cmpf ogt, %30, %31 : vector<32x256xf32>
      %cst_17 = arith.constant 0.000000e+00 : f32
      %33 = vector.broadcast %cst_17 : f32 to vector<32x256xf32>
      %34 = arith.minimumf %30, %33 : vector<32x256xf32>
      %35 = math.exp %34 : vector<32x256xf32>
      %cst_18 = arith.constant 1.000000e+00 : f32
      %36 = vector.broadcast %cst_18 : f32 to vector<32x256xf32>
      %37 = arith.subf %35, %36 : vector<32x256xf32>
      %38 = arith.select %32, %30, %37 : vector<32x256xi1>, vector<32x256xf32>
      %c0_19 = arith.constant 0 : index
      %c0_20 = arith.constant 0 : index
      %39 = vector.load %arg14[%c0_19, %c0_20] : memref<32x256xf32, #tpu.memory_space<vmem>>, vector<32x256xf32>
      %40 = arith.addf %38, %39 : vector<32x256xf32>
      %c0_21 = arith.constant 0 : index
      %c0_22 = arith.constant 0 : index
      %41 = vector.load %arg10[%c0_21, %c0_22] : memref<16x32xbf16, #tpu.memory_space<vmem>>, vector<16x32xbf16>
      %42 = arith.truncf %40 : vector<32x256xf32> to vector<32x256xbf16>
      %cst_23 = arith.constant dense<0.000000e+00> : vector<16x256xf32>
      %43 = tpu.matmul %41, %42, %cst_23 {dimension_numbers = #tpu.dot_dimension_numbers<[1], [0], [0], [1], [0, 0, 1, 1], [], []>} : vector<16x32xbf16>, vector<32x256xbf16>, vector<16x256xf32> -> vector<16x256xf32>
      %c0_24 = arith.constant 0 : index
      %c0_25 = arith.constant 0 : index
      %44 = vector.load %arg11[%c0_24, %c0_25] : memref<16x1xf32, #tpu.memory_space<vmem>>, vector<16x1xf32>
      %45 = vector.broadcast %44 : vector<16x1xf32> to vector<16x256xf32>
      %46 = arith.addf %43, %45 : vector<16x256xf32>
      %47 = arith.truncf %46 : vector<16x256xf32> to vector<16x256xbf16>
      %c0_26 = arith.constant 0 : index
      %c0_27 = arith.constant 0 : index
      %48 = vector.load %arg16[%c0_26, %c0_27] : memref<16x256xbf16, #tpu.memory_space<vmem>>, vector<16x256xbf16>
      tpu.vector_store %arg16[%c0_26, %c0_27], %47 {strides = array<i32>} : memref<16x256xbf16, #tpu.memory_space<vmem>>, vector<16x256xbf16>,
      %49 = arith.truncf %22 : vector<1x256xf32> to vector<1x256xbf16>
      %c5 = arith.constant 5 : index
      %c0_28 = arith.constant 0 : index
      %50 = vector.load %arg16[%c5, %c0_28] : memref<16x256xbf16, #tpu.memory_space<vmem>>, vector<1x256xbf16>
      tpu.vector_store %arg16[%c5, %c0_28], %49 {strides = array<i32>} : memref<16x256xbf16, #tpu.memory_space<vmem>>, vector<1x256xbf16>,
      %cst_29 = arith.constant 0.000000e+00 : f32
      %51 = vector.broadcast %cst_29 : f32 to vector<4x256xf32>
      %c0_30 = arith.constant 0 : index
      %c0_31 = arith.constant 0 : index
      %52 = vector.load %arg17[%c0_30, %c0_31] : memref<4x256xf32, #tpu.memory_space<vmem>>, vector<4x256xf32>
      tpu.vector_store %arg17[%c0_30, %c0_31], %51 {strides = array<i32>} : memref<4x256xf32, #tpu.memory_space<vmem>>, vector<4x256xf32>,
    } else {
    }
    %c1_i32 = arith.constant 1 : i32
    %14 = arith.cmpi eq, %arg0, %c1_i32 : i32
    %15 = arith.extui %14 : i1 to i32
    %c0_i32_8 = arith.constant 0 : i32
    %16 = arith.cmpi ne, %15, %c0_i32_8 : i32
    scf.if %16 {
      %c0_12 = arith.constant 0 : index
      %c0_13 = arith.constant 0 : index
      %22 = vector.load %arg16[%c0_12, %c0_13] : memref<16x256xbf16, #tpu.memory_space<vmem>>, vector<16x256xbf16>
      %cst = arith.constant dense<0.000000e+00> : vector<16x256xf32>
      %23 = tpu.matmul %22, %0, %cst {dimension_numbers = #tpu.dot_dimension_numbers<[1], [0], [0], [1], [0, 0, 1, 1], [], []>} : vector<16x256xbf16>, vector<256x256xbf16>, vector<16x256xf32> -> vector<16x256xf32>
      %24 = vector.extract_strided_slice %23 {offsets = [0, 0], sizes = [4, 256], strides = [1, 1]} : vector<16x256xf32> to vector<4x256xf32>
      %25 = vector.extract_strided_slice %23 {offsets = [4, 0], sizes = [1, 256], strides = [1, 1]} : vector<16x256xf32> to vector<1x256xf32>
      %26 = vector.extract_strided_slice %23 {offsets = [5, 0], sizes = [1, 256], strides = [1, 1]} : vector<16x256xf32> to vector<1x256xf32>
      %cst_14 = arith.constant 0.000000e+00 : f32
      %27 = vector.broadcast %cst_14 : f32 to vector<1x256xf32>
      %28 = arith.cmpf ogt, %25, %27 : vector<1x256xf32>
      %29 = tpu.reciprocal %25 {approx = true} : vector<1x256xf32> -> vector<1x256xf32>
      %cst_15 = arith.constant 0.000000e+00 : f32
      %30 = vector.broadcast %cst_15 : f32 to vector<1x256xf32>
      %31 = arith.select %28, %29, %30 : vector<1x256xi1>, vector<1x256xf32>
      %cst_16 = arith.constant 1.000000e+00 : f32
      %32 = vector.broadcast %cst_16 : f32 to vector<1x256xf32>
      %33 = arith.addf %25, %32 : vector<1x256xf32>
      %34 = tpu.reciprocal %33 {approx = true} : vector<1x256xf32> -> vector<1x256xf32>
      %35 = arith.mulf %26, %34 : vector<1x256xf32>
      %cst_17 = arith.constant 0.000000e+00 : f32
      %36 = vector.broadcast %cst_17 : f32 to vector<1x256xf32>
      %37 = arith.cmpf ogt, %35, %36 : vector<1x256xf32>
      %38 = math.rsqrt %35 : vector<1x256xf32>
      %cst_18 = arith.constant 1.000000e+00 : f32
      %39 = vector.broadcast %cst_18 : f32 to vector<1x256xf32>
      %40 = arith.select %37, %38, %39 : vector<1x256xi1>, vector<1x256xf32>
      %41 = arith.mulf %31, %40 : vector<1x256xf32>
      %42 = vector.broadcast %41 : vector<1x256xf32> to vector<4x256xf32>
      %43 = arith.mulf %42, %24 : vector<4x256xf32>
      %44 = arith.truncf %43 : vector<4x256xf32> to vector<4x256xbf16>
      %c0_19 = arith.constant 0 : index
      %c0_20 = arith.constant 0 : index
      %45 = vector.load %arg17[%c0_19, %c0_20] : memref<4x256xf32, #tpu.memory_space<vmem>>, vector<4x256xf32>
      %cst_21 = arith.constant dense<0.000000e+00> : vector<4x256xf32>
      %46 = tpu.matmul %44, %0, %cst_21 {dimension_numbers = #tpu.dot_dimension_numbers<[1], [1], [0], [0], [0, 0, 1, 0], [], []>} : vector<4x256xbf16>, vector<256x256xbf16>, vector<4x256xf32> -> vector<4x256xf32>
      %47 = arith.addf %45, %46 : vector<4x256xf32>
      %c0_22 = arith.constant 0 : index
      %c0_23 = arith.constant 0 : index
      %48 = vector.load %arg17[%c0_22, %c0_23] : memref<4x256xf32, #tpu.memory_space<vmem>>, vector<4x256xf32>
      tpu.vector_store %arg17[%c0_22, %c0_23], %47 {strides = array<i32>} : memref<4x256xf32, #tpu.memory_space<vmem>>, vector<4x256xf32>,
    } else {
    }
    %c1_i32_9 = arith.constant 1 : i32
    %17 = arith.cmpi eq, %arg0, %c1_i32_9 : i32
    %c0_i32_10 = arith.constant 0 : i32
    %18 = arith.cmpi eq, %arg1, %c0_i32_10 : i32
    %19 = arith.andi %17, %18 : i1
    %20 = arith.extui %19 : i1 to i32
    %c0_i32_11 = arith.constant 0 : i32
    %21 = arith.cmpi ne, %20, %c0_i32_11 : i32
    scf.if %21 {
      %c32 = arith.constant 32 : index
      %c0_12 = arith.constant 0 : index
      %22 = vector.load %arg15[%c32, %c0_12] : memref<48x256xf32, #tpu.memory_space<vmem>>, vector<1x256xf32>
      %cst = arith.constant 0.000000e+00 : f32
      %23 = vector.broadcast %cst : f32 to vector<1x256xf32>
      %24 = arith.cmpf ogt, %22, %23 : vector<1x256xf32>
      %25 = math.rsqrt %22 : vector<1x256xf32>
      %cst_13 = arith.constant 0.000000e+00 : f32
      %26 = vector.broadcast %cst_13 : f32 to vector<1x256xf32>
      %27 = arith.select %24, %25, %26 : vector<1x256xi1>, vector<1x256xf32>
      %c0_14 = arith.constant 0 : index
      %c0_15 = arith.constant 0 : index
      %28 = vector.load %arg17[%c0_14, %c0_15] : memref<4x256xf32, #tpu.memory_space<vmem>>, vector<4x256xf32>
      %29 = vector.broadcast %27 : vector<1x256xf32> to vector<4x256xf32>
      %30 = arith.mulf %29, %28 : vector<4x256xf32>
      %c0_16 = arith.constant 0 : index
      %c0_17 = arith.constant 0 : index
      %31 = vector.load %arg12[%c0_16, %c0_17] : memref<4x256xf32, #tpu.memory_space<vmem>>, vector<4x256xf32>
      tpu.vector_store %arg12[%c0_16, %c0_17], %30 {strides = array<i32>} : memref<4x256xf32, #tpu.memory_space<vmem>>, vector<4x256xf32>,
    } else {
    }
    return
  }
  func.func @transform_0(%arg0: i32, %arg1: i32) -> (i32, i32) {
    %c0_i32 = arith.constant 0 : i32
    %c0_i32_0 = arith.constant 0 : i32
    %c0_i32_1 = arith.constant 0 : i32
    return %c0_i32, %c0_i32_0 : i32, i32
  }
  func.func @transform_1(%arg0: i32, %arg1: i32) -> (i32, i32) {
    %c0_i32 = arith.constant 0 : i32
    %c0_i32_0 = arith.constant 0 : i32
    return %c0_i32, %arg1 : i32, i32
  }
  func.func @transform_2(%arg0: i32, %arg1: i32) -> (i32, i32) {
    %c1_i32 = arith.constant 1 : i32
    %0 = arith.subi %c1_i32, %arg0 : i32
    %1 = arith.muli %arg1, %0 : i32
    %c0_i32 = arith.constant 0 : i32
    %c0_i32_0 = arith.constant 0 : i32
    return %c0_i32, %1 : i32, i32
  }
  func.func @transform_3(%arg0: i32, %arg1: i32) -> (i32, i32) {
    %c0_i32 = arith.constant 0 : i32
    %c0_i32_0 = arith.constant 0 : i32
    %c0_i32_1 = arith.constant 0 : i32
    return %c0_i32, %c0_i32_0 : i32, i32
  }
  func.func @transform_4(%arg0: i32, %arg1: i32) -> (i32, i32) {
    %c0_i32 = arith.constant 0 : i32
    %c0_i32_0 = arith.constant 0 : i32
    %c0_i32_1 = arith.constant 0 : i32
    return %c0_i32, %c0_i32_0 : i32, i32
  }
  func.func @transform_5(%arg0: i32, %arg1: i32) -> (i32, i32) {
    %c0_i32 = arith.constant 0 : i32
    %c0_i32_0 = arith.constant 0 : i32
    %c0_i32_1 = arith.constant 0 : i32
    return %c0_i32, %c0_i32_0 : i32, i32
  }
  func.func @transform_6(%arg0: i32, %arg1: i32) -> (i32, i32) {
    %c0_i32 = arith.constant 0 : i32
    %c0_i32_0 = arith.constant 0 : i32
    %c0_i32_1 = arith.constant 0 : i32
    return %c0_i32, %c0_i32_0 : i32, i32
  }
  func.func @transform_7(%arg0: i32, %arg1: i32) -> (i32, i32) {
    %c0_i32 = arith.constant 0 : i32
    %c0_i32_0 = arith.constant 0 : i32
    %c0_i32_1 = arith.constant 0 : i32
    return %c0_i32, %c0_i32_0 : i32, i32
  }
  func.func @transform_8(%arg0: i32, %arg1: i32) -> (i32, i32) {
    %c0_i32 = arith.constant 0 : i32
    %c0_i32_0 = arith.constant 0 : i32
    %c0_i32_1 = arith.constant 0 : i32
    return %c0_i32, %c0_i32_0 : i32, i32
  }
  func.func @transform_9(%arg0: i32, %arg1: i32) -> (i32, i32) {
    %c0_i32 = arith.constant 0 : i32
    %c0_i32_0 = arith.constant 0 : i32
    %c0_i32_1 = arith.constant 0 : i32
    return %c0_i32, %c0_i32_0 : i32, i32
  }
  func.func @transform_10(%arg0: i32, %arg1: i32) -> (i32, i32) {
    %c0_i32 = arith.constant 0 : i32
    %c0_i32_0 = arith.constant 0 : i32
    %c0_i32_1 = arith.constant 0 : i32
    return %c0_i32, %c0_i32_0 : i32, i32
  }
}

</mosaic_0001>

<bundles_post_ra>
// kernel: dphgnn_forward.1
= control target key start
LH: loop header
LB: loop body
LE: loop exit
PB: predicated region body
PF: predicated region fallthrough
CT: control target
= control target key end

     0   :  { %s2460_s13 = smov 0   ;;  %s2462_s14 = smov 0   ;;  %s3011_s0 = inlined_call_operand.vmem [shape: bf16[10,256], index: 0, kind: input, shape index: {}]   ;;  %s3012_s1 = inlined_call_operand.vmem [shape: bf16[256,256], index: 1, kind: input, shape index: {}]   ;;  %s3013_s2 = inlined_call_operand.vmem [shape: bf16[42,256], index: 2, kind: input, shape index: {}]   ;;  %s3014_s3 = inlined_call_operand.vmem [shape: bf16[88,10], index: 3, kind: input, shape index: {}]   ;;  %s3015_s4 = inlined_call_operand.vmem [shape: f32[88,1], index: 4, kind: input, shape index: {}]   ;;  %s3016_s5 = inlined_call_operand.vmem [shape: bf16[48,32], index: 5, kind: input, shape index: {}]   ;;  %s3017_s6 = inlined_call_operand.vmem [shape: bf16[48,42], index: 6, kind: input, shape index: {}]   ;;  %s3018_s7 = inlined_call_operand.vmem [shape: f32[48,1], index: 7, kind: input, shape index: {}]   ;;  %s3019_s8 = inlined_call_operand.vmem [shape: bf16[16,32], index: 8, kind: input, shape index: {}]   ;;  %s3020_s9 = inlined_call_operand.vmem [shape: f32[16,1], index: 9, kind: input, shape index: {}]   ;;  %s3021_s10 = inlined_call_operand.vmem [shape: f32[4,256], index: 10, kind: output, shape index: {}]  }
   0x1   :  { %s2464_s15 = smov 0  }
   0x2 LB: > { %s32_s16 = sadd.s32 1, %s2394_s14  ;;  %p2095_p0 = scmp.ge.s32.totalorder %s2398_s15, 1  ;;  %s2398_s15 = sphi %s2464_s15, %s20_s15   ;;  %s2394_s14 = sphi %s2462_s14, %s3037_s14   ;;  %s2390_s13 = sphi %s2460_s13, %s3036_s13  }
   0x3   : > { %p34_p1 = scmp.ge.s32.totalorder %s32_s16, 2  ;;  %p339_p2 = scmp.lt.s32.totalorder %s2398_s15, 3 }
   0x5   : > { %s3039_s16 = smov (%p34_p1, %s32_s16), 0  ;;  %p340_p3 = pnand %p2095_p0, %p339_p2 }
   0x7   : > { %343 = sbr.rel (%p340_p3) target bundleno = 1975 (0x7b7), region = 60 }
   0xc   : > { %v2483_v0 = vld [vmem:[%s3012_s1] sm:$0xff]  ;;  %v2488_v1 = vld [vmem:[%s3012_s1 + $0x8] sm:$0xff]  ;;  %v2493_v2 = vld [vmem:[%s3012_s1 + $0x10] sm:$0xff]  ;;  %p428_p4 = scmp.eq.s32.totalorder %s2390_s13, 0 }
   0xd   : > { %v2499_v3 = vld [vmem:[%s3012_s1 + $0x18] sm:$0xff]  ;;  %v2504_v4 = vld [vmem:[%s3012_s1 + $0x20] sm:$0xff]  ;;  %v2509_v5 = vld [vmem:[%s3012_s1 + $0x28] sm:$0xff]  ;;  %vm568_vm0 = vcmask (%p428_p4), 1044480   ;;  %v2400_v34 = vmov (%p428_p4), 0   ;;  %vm549_vm1 = vcmask (%p428_p4), 80896  }
   0xe   : > { %v2514_v6 = vld [vmem:[%s3012_s1 + $0x30] sm:$0xff]  ;;  %v2519_v7 = vld [vmem:[%s3012_s1 + $0x38] sm:$0xff]  ;;  %v2524_v8 = vld [vmem:[%s3012_s1 + $0x40] sm:$0xff]  ;;  %637 = vmatprep.mubr.bf16.mxu1 (%p428_p4), %v2400_v34  ;;  %2278 = vset.pattern.permute.xlu1 (%p428_p4), %v2400_v34  ;;  %vm680_vm4 = vcmask (%p428_p4), 1040384  }
   0xf   : > { %v2529_v9 = vld [vmem:[%s3012_s1 + $0x48] sm:$0xff]  ;;  %v2534_v10 = vld [vmem:[%s3012_s1 + $0x50] sm:$0xff]  ;;  %v2539_v11 = vld [vmem:[%s3012_s1 + $0x58] sm:$0xff]  ;;  %2277 = vset.pattern.permute.xlu0 (%p428_p4), %v2400_v34  ;;  %607 = vmatprep.mubr.bf16.mxu0 (%p428_p4), %v2400_v34 }
  0x10   : > { %v2544_v12 = vld [vmem:[%s3012_s1 + $0x60] sm:$0xff]  ;;  %v2549_v13 = vld [vmem:[%s3012_s1 + $0x68] sm:$0xff]  ;;  %v2554_v14 = vld [vmem:[%s3012_s1 + $0x70] sm:$0xff] }
  0x11   : > { %v2559_v15 = vld [vmem:[%s3012_s1 + $0x78] sm:$0xff]  ;;  %v2564_v16 = vld [vmem:[%s3012_s1 + $0x80] sm:$0xff]  ;;  %v2569_v17 = vld [vmem:[%s3012_s1 + $0x88] sm:$0xff] }
  0x12   : > { %3028 = vst [vmem:[#allocation7_spill] sm:$0xff] %v2564_v16  ;;  %3029 = vst [vmem:[#allocation8_spill] sm:$0xff] %v2569_v17  ;;  %v2574_v18 = vld [vmem:[%s3012_s1 + $0x90] sm:$0xff]  ;;  %v2579_v19 = vld [vmem:[%s3012_s1 + $0x98] sm:$0xff]  ;;  %433 = sbr.rel (!%p428_p4) target bundleno = 413 (0x19d), region = 64 }
  0x13   : > { %3030 = vst [vmem:[#allocation9_spill] sm:$0xff] %v2574_v18  ;;  %v2584_v20 = vld [vmem:[%s3012_s1 + $0xa0] sm:$0xff]  ;;  %v2589_v21 = vld [vmem:[%s3012_s1 + $0xa8] sm:$0xff]  ;;  %v2594_v22 = vld [vmem:[%s3012_s1 + $0xb0] sm:$0xff] }
  0x14   : > { %v2599_v23 = vld [vmem:[%s3012_s1 + $0xb8] sm:$0xff]  ;;  %v2604_v24 = vld [vmem:[%s3012_s1 + $0xc0] sm:$0xff]  ;;  %v2609_v25 = vld [vmem:[%s3012_s1 + $0xc8] sm:$0xff] }
  0x15   : > { %v2614_v26 = vld [vmem:[%s3012_s1 + $0xd0] sm:$0xff]  ;;  %v2619_v27 = vld [vmem:[%s3012_s1 + $0xd8] sm:$0xff]  ;;  %v2624_v28 = vld [vmem:[%s3012_s1 + $0xe0] sm:$0xff] }
  0x16   : > { %v2629_v29 = vld [vmem:[%s3012_s1 + $0xe8] sm:$0xff]  ;;  %v2634_v30 = vld [vmem:[%s3012_s1 + $0xf0] sm:$0xff]  ;;  %v2639_v31 = vld [vmem:[%s3012_s1 + $0xf8] sm:$0xff] }
  0x17   : > { %v2279_v32 = vld [vmem:[%s3011_s0 + $0x4] ss:$8 sps:$4 sm:$0x1f]   ;;  %v2281_v33 = vld [vmem:[%s3011_s0] ss:$8 sps:$4 sm:$0x1f]  }
  0x18   : > { %2246 = vmatprep.subr.msk.bf16.mxu1 %vm568_vm0, %v2279_v32  ;;  %v2282_v35 = vld [vmem:[%s3014_s3 + $0x18] sm:$0xff]   ;;  %v570_v36 = vsel %vm568_vm0, %v2281_v33, 0  ;;  %v451_v37 = vld [vmem:[%s3015_s4 + $0x20] sm:$0xff]  ;;  %v452_v38 = vld [vmem:[%s3015_s4 + $0x28] sm:$0xff]  ;;  %2105 = vmatprep.subr.msk.bf16.mxu0 %vm568_vm0, %v2279_v32 }
  0x19   : > { %2247 = vmatpush1.bf16.msra.mxu1 %v570_v36  ;;  %480 = vperm.xlu1 %2278, %v451_v37   ;;  %v457_v39 = vld [vmem:[%s3015_s4 + $0x50] sm:$0xff]  ;;  %v2285_v40 = vld [vmem:[%s3014_s3] sm:$0xff]   ;;  %v454_v43 = vld [vmem:[%s3015_s4 + $0x38] sm:$0xff] }
  0x1a   : > { %590 = vmatpush1.bf16.msra.mxu0 %v570_v36  ;;  %510 = vperm.xlu0 %2277, %v457_v39   ;;  %v453_v41 = vld [vmem:[%s3015_s4 + $0x30] sm:$0xff]  ;;  %v2283_v42 = vld [vmem:[%s3014_s3 + $0x20] sm:$0xff]   ;;  %v2286_v44 = vld [vmem:[%s3014_s3 + $0x8] sm:$0xff]  }
  0x1b   : > { %v455_v45 = vld [vmem:[%s3015_s4 + $0x40] sm:$0xff]  ;;  %v2284_v46 = vld [vmem:[%s3014_s3 + $0x28] ss:$0 sps:$4 sm:$0xff]   ;;  %v2287_v48 = vld [vmem:[%s3014_s3 + $0x10] sm:$0xff]  }
  0x1c   : > { %2109 = vmatmul.mubr.msk.bf16.vlgmr.msra.gmra.mxu1 %vm549_vm1, %v2282_v35  ;;  %v456_v47 = vld [vmem:[%s3015_s4 + $0x48] sm:$0xff]  ;;  %v447_v49 = vld [vmem:[%s3015_s4] sm:$0xff]  ;;  %v449_v51 = vld [vmem:[%s3015_s4 + $0x10] sm:$0xff] }
  0x1d   : > { %647 = vmatprep.mubr.bf16.mxu1 %v2400_v34  ;;  %485 = vperm.xlu1 %2278, %v452_v38   ;;  %v448_v50 = vld [vmem:[%s3015_s4 + $0x8] sm:$0xff] }
  0x1e   : > { %2106 = vmatmul.mubr.msk.bf16.vlgmr.msra.gmra.mxu0 %vm549_vm1, %v2285_v40 }
  0x1f   : > { %617 = vmatprep.mubr.bf16.mxu0 %v2400_v34 }
  0x21   : > { %490 = vperm.xlu1 %2278, %v453_v41  }
  0x24   : > { %2110 = vmatmul.mubr.msk.bf16.gmra.mxu1 %vm549_vm1, %v2283_v42 }
  0x25   : > { %657 = vmatprep.mubr.bf16.mxu1 %v2400_v34  ;;  %495 = vperm.xlu1 %2278, %v454_v43  }
  0x26   : > { %2107 = vmatmul.mubr.msk.bf16.gmra.mxu0 %vm549_vm1, %v2286_v44 }
  0x27   : > { %627 = vmatprep.mubr.bf16.mxu0 %v2400_v34 }
  0x29   : > { %500 = vperm.xlu1 %2278, %v455_v45  }
  0x2c   : > { %2111 = vmatmul.mubr.msk.bf16.gmra.mxu1 %vm549_vm1, %v2284_v46 }
  0x2d   : > { %505 = vperm.xlu1 %2278, %v456_v47  }
  0x2e   : > { %2108 = vmatmul.mubr.msk.bf16.gmra.mxu0 %vm549_vm1, %v2287_v48 }
  0x31   : > { %460 = vperm.xlu1 %2278, %v447_v49  }
  0x35   : > { %465 = vperm.xlu1 %2278, %v448_v50  }
  0x39   : > { %470 = vperm.xlu1 %2278, %v449_v51  }
  0x94   : > { %v2703_v52 = vpop.permute.xlu1 %480 }
  0x95   : > { %v511_v44 = vpop.permute.xlu0 %510 }
  0x98   : > { %v2705_v53 = vpop.permute.xlu1 %485 }
  0x9c   : > { %v491_v54 = vpop.permute.xlu1 %490 }
  0xa0   : > { %v496_v55 = vpop.permute.xlu1 %495 }
  0xa4   : > { %v501_v61 = vpop.permute.xlu1 %500 }
  0xa8   : > { %v506_v38 = vpop.permute.xlu1 %505 }
  0xac   : > { %v461_v50 = vpop.permute.xlu1 %460 }
  0xdc   : > { %v639_v56 = vpop.f32.mrf.mxu1 }
  0xdd   : > { %v2707_v57 = vadd.f32 %v639_v56, %v491_v54 }
  0xde   : > { %v641_v58 = vpop.f32.mrf.mxu1  ;;  %v609_v63 = vpop.f32.mrf.mxu0 }
  0xdf   : > { %v2709_v59 = vadd.f32 %v641_v58, %v491_v54 }
  0xe0   : > { %v643_v60 = vpop.f32.mrf.mxu1  ;;  %v611_v36 = vpop.f32.mrf.mxu0 }
  0xe1   : > { %v2711_v62 = vadd.f32 %v643_v60, %v496_v55  ;;  %v612_v58 = vadd.f32 %v611_v36, %v461_v50 }
  0xe2   : > { %v645_v32 = vpop.f32.mrf.mxu1  ;;  %v613_v42 = vpop.f32.mrf.mxu0 }
  0xe3   : > { %v2713_v33 = vadd.f32 %v645_v32, %v496_v55  ;;  %v610_v55 = vadd.f32 %v609_v63, %v461_v50  ;;  %667 = vst [vmem:[#allocation3 + $0x8] sm:$0xff] %v612_v58  ;;  %v2401_v50 = vmov 0.0   ;;  %v692_v58 = vlaneseq }
  0xe4   : > { %v649_v34 = vpop.f32.mrf.mxu1  ;;  %v615_v48 = vpop.f32.mrf.mxu0  ;;  %754 = vst [vmem:[#allocation4] sm:$0xff] %v2401_v50  ;;  %755 = vst [vmem:[#allocation4 + $0x8] sm:$0xff] %v2401_v50 }
  0xe5   : > { %v2715_v35 = vadd.f32 %v649_v34, %v501_v61  ;;  %666 = vst [vmem:[#allocation3] sm:$0xff] %v610_v55  ;;  %756 = vst [vmem:[#allocation4 + $0x10] sm:$0xff] %v2401_v50 }
  0xe6   : > { %v651_v37 = vpop.f32.mrf.mxu1  ;;  %v619_v32 = vpop.f32.mrf.mxu0  ;;  %757 = vst [vmem:[#allocation4 + $0x18] sm:$0xff] %v2401_v50  ;;  %758 = vst [vmem:[#allocation4 + $0x20] sm:$0xff] %v2401_v50 }
  0xe7   : > { %v2717_v39 = vadd.f32 %v651_v37, %v501_v61  ;;  %v466_v37 = vpop.permute.xlu1 %465  ;;  %759 = vst [vmem:[#allocation4 + $0x28] sm:$0xff] %v2401_v50  ;;  %760 = vst [vmem:[#allocation4 + $0x30] sm:$0xff] %v2401_v50 }
  0xe8   : > { %v653_v40 = vpop.f32.mrf.mxu1  ;;  %v621_v63 = vpop.f32.mrf.mxu0  ;;  %761 = vst [vmem:[#allocation4 + $0x38] sm:$0xff] %v2401_v50  ;;  %762 = vst [vmem:[#allocation4 + $0x40] sm:$0xff] %v2401_v50 }
  0xe9   : > { %v2719_v41 = vadd.f32 %v653_v40, %v506_v38  ;;  %v614_v40 = vadd.f32 %v613_v42, %v466_v37  ;;  %763 = vst [vmem:[#allocation4 + $0x48] sm:$0xff] %v2401_v50  ;;  %764 = vst [vmem:[#allocation4 + $0x50] sm:$0xff] %v2401_v50 }
  0xea   : > { %v655_v43 = vpop.f32.mrf.mxu1  ;;  %765 = vst [vmem:[#allocation4 + $0x58] sm:$0xff] %v2401_v50 }
  0xeb   : > { %v2721_v45 = vadd.f32 %v655_v43, %v506_v38  ;;  %v616_v43 = vadd.f32 %v615_v48, %v466_v37  ;;  %668 = vst [vmem:[#allocation3 + $0x20] sm:$0xff] %v614_v40  ;;  %v693_v40 = vshrl.u32 %v692_v58, 7 }
  0xec   : > { %v659_v46 = vpop.f32.mrf.mxu1 }
  0xed   : > { %v660_v47 = vadd.f32 %v659_v46, %v511_v44  ;;  %669 = vst [vmem:[#allocation3 + $0x18] sm:$0xff] %v616_v43 }
  0xee   : > { %v661_v49 = vpop.f32.mrf.mxu1 }
  0xef   : > { %vm674_vm2 = vcmp.ge.f32.partialorder %v660_v47, 0.0  ;;  %v676_v51 = vmul.f32 0.2, %v660_v47  ;;  %v662_v54 = vadd.f32 %v661_v49, %v511_v44  ;;  %v471_v44 = vpop.permute.xlu1 %470 }
  0xf0   : > { %v663_v56 = vpop.f32.mrf.mxu1  ;;  %v620_v36 = vadd.f32 %v619_v32, %v471_v44  ;;  %v622_v49 = vadd.f32 %v621_v63, %v471_v44 }
  0xf1   : > { %vm675_vm3 = vcmp.ge.f32.partialorder %v662_v54, 0.0  ;;  %v677_v60 = vmul.f32 0.2, %v662_v54  ;;  %v678_v61 = vsel %vm674_vm2, %v660_v47, %v676_v51  ;;  %v450_v47 = vld [vmem:[%s3015_s4 + $0x18] sm:$0xff] }
  0xf2   : > { %v664_v34 = vpop.f32.mrf.mxu1  ;;  %v681_v46 = vsel %vm680_vm4, %v678_v61, -inf  ;;  %670 = vst [vmem:[#allocation3 + $0x28] sm:$0xff] %v620_v36  ;;  %671 = vst [vmem:[#allocation3 + $0x30] sm:$0xff] %v622_v49 }
  0xf3   : > { %v679_v38 = vsel %vm675_vm3, %v662_v54, %v677_v60 }
  0xf4   : > { %v682_v16 = vsel %vm680_vm4, %v679_v38, -inf }
  0xf5   : > { %v683_v17 = vmax.f32 %v681_v46, %v682_v16  ;;  %v623_v16 = vpop.f32.mrf.mxu0  ;;  %v694_v46 = vsub.s32 0, %v693_v40 }
  0xf7   : > { %684 = vmax.xlane.f32.xlu0 %v683_v17  ;;  %v625_v42 = vpop.f32.mrf.mxu0 }
  0xf9   : > { %v629_v56 = vpop.f32.mrf.mxu0 }
  0xfb   : > { %v631_v32 = vpop.f32.mrf.mxu0 }
  0xfd   : > { %v633_v43 = vpop.f32.mrf.mxu0 }
  0xff   : > { %v635_v63 = vpop.f32.mrf.mxu0 }
 0x100   : > { %v636_v50 = vadd.f32 %v635_v63, %v2705_v53 }
 0x10d   : > { %475 = vperm.xlu0 %2277, %v450_v47   ;;  %v632_v47 = vadd.f32 %v631_v32, %v2703_v52 }
 0x180   : > { %v685_v17 = vpop.xlane.xlu0 %684 }
 0x181   : > { %v686_v48 = vsub.f32 %v678_v61, %v685_v17  ;;  %v687_v51 = vsub.f32 %v679_v38, %v685_v17  ;;  %v630_v61 = vadd.f32 %v629_v56, %v2703_v52  ;;  %v634_v38 = vadd.f32 %v633_v43, %v2705_v53 }
 0x183   : > { %v688_v54 = vmul.f32 1.442695, %v686_v48  ;;  %v690_v55 = vmul.f32 1.442695, %v687_v51 }
 0x185   : > { %2288 = vpow2.f32 %v688_v54 }
 0x186   : > { %2290 = vpow2.f32 %v690_v55 }
 0x188   : > { %v476_v60 = vpop.permute.xlu0 %475 }
 0x189   : > { %v624_v34 = vadd.f32 %v623_v16, %v476_v60  ;;  %v626_v37 = vadd.f32 %v625_v42, %v476_v60 }
 0x18b   : > { %672 = vst [vmem:[#allocation3 + $0x10] sm:$0xff] %v624_v34  ;;  %673 = vst [vmem:[#allocation3 + $0x38] sm:$0xff] %v626_v37 }
 0x192   : > { %v2289_v44 = vpop.eup %2288 }
 0x193   : > { %v2291_v36 = vpop.eup %2290  ;;  %v695_v49 = vrot.slane %v2289_v44, %v694_v46 }
 0x194   : > { %v699_v17 = vrot.slane %v2291_v36, %v694_v46 }
 0x195   : > { %v700_v16 = vmul.f32 %v695_v49, %v630_v61  ;;  %v702_v42 = vmul.f32 %v695_v49, %v634_v38  ;;  %v704_v48 = vmul.f32 %v695_v49, %v2707_v57  ;;  %v706_v51 = vmul.f32 %v695_v49, %v2711_v62 }
 0x196   : > { %v701_v54 = vmul.f32 %v699_v17, %v632_v47  ;;  %v703_v55 = vmul.f32 %v699_v17, %v636_v50  ;;  %v705_v58 = vmul.f32 %v699_v17, %v2709_v59  ;;  %v707_v56 = vmul.f32 %v699_v17, %v2713_v33 }
 0x197   : > { %v708_v60 = vmul.f32 %v695_v49, %v2715_v35  ;;  %v709_v34 = vmul.f32 %v699_v17, %v2717_v39  ;;  %v710_v52 = vmul.f32 %v695_v49, %v2719_v41  ;;  %v711_v53 = vmul.f32 %v699_v17, %v2721_v45 }
 0x198   : > { %v2236_v32 = vpack.c.bf16 %v701_v54, %v700_v16  ;;  %v2237_v37 = vpack.c.bf16 %v703_v55, %v702_v42  ;;  %v2238_v40 = vpack.c.bf16 %v705_v58, %v704_v48  ;;  %v2239_v57 = vpack.c.bf16 %v707_v56, %v706_v51 }
 0x199   : > { %v2240_v43 = vpack.c.bf16 %v709_v34, %v708_v60  ;;  %v2241_v62 = vpack.c.bf16 %v711_v53, %v710_v52 }
 0x19a   : > { %748 = vst [vmem:[#allocation2 + $0x28] sm:$0xff] %v2236_v32  ;;  %749 = vst [vmem:[#allocation2 + $0x10] sm:$0xff] %v2237_v37 }
 0x19b   : > { %750 = vst [vmem:[#allocation2 + $0x8] sm:$0xff] %v2238_v40  ;;  %751 = vst [vmem:[#allocation2] sm:$0xff] %v2239_v57 }
 0x19c   : > { %752 = vst [vmem:[#allocation2 + $0x18] sm:$0xff] %v2240_v43  ;;  %753 = vst [vmem:[#allocation2 + $0x20] sm:$0xff] %v2241_v62 }
 0x19d PF: > { %p2118_p5 = scmp.ne.s32.totalorder %s2390_s13, 0 }
 0x19f   : > { %768 = sbr.rel (%p2118_p5) target bundleno = 1172 (0x494), region = 68 }
 0x1a4   : > { %v2140_v59 = vcombine.high %v2554_v14, %v2559_v15  ;;  %v2139_v33 = vcombine.low %v2554_v14, %v2559_v15  ;;  %v2138_v35 = vcombine.high %v2544_v12, %v2549_v13  ;;  %v2296_v39 = vld [vmem:[#allocation2 + $0x2c] ss:$-24 sps:$4 sm:$0xff]   ;;  %v2137_v41 = vcombine.low %v2544_v12, %v2549_v13 }
 0x1a5   : > { %v2136_v45 = vcombine.high %v2534_v10, %v2539_v11  ;;  %997 = vmatprep.mubr.bf16.mxu0 %v2296_v39  ;;  %v2135_v46 = vcombine.low %v2534_v10, %v2539_v11  ;;  %v2134_v63 = vcombine.high %v2524_v8, %v2529_v9  ;;  %v2133_v44 = vcombine.low %v2524_v8, %v2529_v9  ;;  %v3031_v57 = vld [vmem:[#allocation8_spill] sm:$0xff]  ;;  %v3032_v43 = vld [vmem:[#allocation7_spill] sm:$0xff] }
 0x1a6   : > { %965 = vmatprep.subr.bf16.mxu0 %v2140_v59  ;;  %1395 = vmatprep.subr.bf16.mxu1 %v2140_v59  ;;  %v2132_v36 = vcombine.high %v2514_v6, %v2519_v7  ;;  %v2131_v61 = vcombine.low %v2514_v6, %v2519_v7  ;;  %v2130_v38 = vcombine.high %v2504_v4, %v2509_v5  ;;  %v2299_v39 = vld [vmem:[#allocation2 + $0x8] ss:$-8 sps:$4 sm:$0xff]   ;;  %vm1171_vm5 = vcmask 1044480  }
 0x1a7   : > { %966 = vmatpush1.bf16.msra.mxu0 %v2139_v33  ;;  %1396 = vmatpush1.bf16.xpose.msra.mxu1 %v2139_v33  ;;  %v2129_v49 = vcombine.low %v2504_v4, %v2509_v5  ;;  %v2128_v47 = vcombine.high %v2493_v2, %v2499_v3  ;;  %v2127_v50 = vcombine.low %v2493_v2, %v2499_v3  ;;  %v2294_v33 = vld [vmem:[#allocation2 + $0x28] ss:$-24 sps:$4 sm:$0xff]   ;;  %vm1161_vm6 = vcmask 343040  }
 0x1a8   : > { %967 = vmatprep.subr.bf16.mxu0 %v2138_v35  ;;  %1397 = vmatprep.subr.bf16.mxu1 %v2138_v35  ;;  %v2126_v17 = vcombine.high %v2483_v0, %v2488_v1  ;;  %v2125_v16 = vcombine.low %v2483_v0, %v2488_v1  ;;  %v2156_v42 = vcombine.high %v2634_v30, %v2639_v31  ;;  %v2297_v35 = vld [vmem:[#allocation2 + $0xc] ss:$-8 sps:$4 sm:$0xff]   ;;  %vm1256_vm1 = vcmask 261120  }
 0x1a9   : > { %v2155_v48 = vcombine.low %v2634_v30, %v2639_v31  ;;  %v2154_v51 = vcombine.high %v2624_v28, %v2629_v29  ;;  %v2153_v54 = vcombine.low %v2624_v28, %v2629_v29  ;;  %v2152_v55 = vcombine.high %v2614_v26, %v2619_v27 }
 0x1aa   : > { %v2151_v58 = vcombine.low %v2614_v26, %v2619_v27  ;;  %v2150_v56 = vcombine.high %v2604_v24, %v2609_v25  ;;  %v2149_v60 = vcombine.low %v2604_v24, %v2609_v25  ;;  %v2148_v34 = vcombine.high %v2594_v22, %v2599_v23 }
 0x1ab   : > { %968 = vmatpush1.bf16.msra.mxu0 %v2137_v41  ;;  %v2147_v52 = vcombine.low %v2594_v22, %v2599_v23  ;;  %v2146_v53 = vcombine.high %v2584_v20, %v2589_v21  ;;  %v2145_v32 = vcombine.low %v2584_v20, %v2589_v21  ;;  %v2144_v37 = vcombine.high %v2574_v18, %v2579_v19 }
 0x1ac   : > { %969 = vmatprep.subr.bf16.mxu0 %v2136_v45  ;;  %v2143_v40 = vcombine.low %v2574_v18, %v2579_v19  ;;  %v2142_v62 = vcombine.high %v3032_v43, %v3031_v57  ;;  %v2141_v59 = vcombine.low %v3032_v43, %v3031_v57 }
 0x1af   : > { %970 = vmatpush1.bf16.msra.mxu0 %v2135_v46  ;;  %1398 = vmatpush1.bf16.xpose.msra.mxu1 %v2137_v41  ;;  %v2300_v41 = vld [vmem:[#allocation2 + $0x1c] ss:$8 sps:$4 sm:$0xff]  }
 0x1b0   : > { %971 = vmatprep.subr.bf16.mxu0 %v2134_v63  ;;  %1399 = vmatprep.subr.bf16.mxu1 %v2136_v45  ;;  %v2302_v45 = vld [vmem:[#allocation2 + $0x18] ss:$8 sps:$4 sm:$0xff]  }
 0x1b3   : > { %972 = vmatpush1.bf16.msra.mxu0 %v2133_v44 }
 0x1b4   : > { %973 = vmatprep.subr.bf16.mxu0 %v2132_v36 }
 0x1b7   : > { %974 = vmatpush1.bf16.msra.mxu0 %v2131_v61  ;;  %1400 = vmatpush1.bf16.xpose.msra.mxu1 %v2135_v46  ;;  %v2303_v46 = vld [vmem:[%s3013_s2 + $0x24] ss:$8 sps:$4 sm:$0x1f]  }
 0x1b8   : > { %975 = vmatprep.subr.bf16.mxu0 %v2130_v38  ;;  %1401 = vmatprep.subr.bf16.mxu1 %v2134_v63  ;;  %v2305_v63 = vld [vmem:[%s3013_s2 + $0x20] ss:$8 sps:$4 sm:$0x1f]  }
 0x1bb   : > { %976 = vmatpush1.bf16.msra.mxu0 %v2129_v49 }
 0x1bc   : > { %977 = vmatprep.subr.bf16.mxu0 %v2128_v47 }
 0x1bf   : > { %978 = vmatpush1.bf16.msra.mxu0 %v2127_v50  ;;  %1402 = vmatpush1.bf16.xpose.msra.mxu1 %v2133_v44  ;;  %v1173_v44 = vsel %vm1171_vm5, %v2305_v63, 0 }
 0x1c0   : > { %979 = vmatprep.subr.bf16.mxu0 %v2126_v17  ;;  %1403 = vmatprep.subr.bf16.mxu1 %v2132_v36  ;;  %v2308_v36 = vld [vmem:[%s3013_s2 + $0x14] ss:$8 sps:$4 sm:$0xff]  }
 0x1c3   : > { %980 = vmatpush1.bf16.msra.mxu0 %v2125_v16 }
 0x1c4   : > { %981 = vmatprep.subr.bf16.mxu0 %v2156_v42 }
 0x1c7   : > { %982 = vmatpush2.bf16.msra.mxu0 %v2155_v48  ;;  %1404 = vmatpush1.bf16.xpose.msra.mxu1 %v2131_v61  ;;  %v2306_v61 = vld [vmem:[%s3013_s2 + $0x10] ss:$8 sps:$4 sm:$0xff]  }
 0x1c8   : > { %983 = vmatprep.subr.bf16.mxu0 %v2154_v51  ;;  %1405 = vmatprep.subr.bf16.mxu1 %v2130_v38  ;;  %v2311_v38 = vld [vmem:[%s3013_s2 + $0x4] ss:$8 sps:$4 sm:$0xff]  }
 0x1cb   : > { %984 = vmatpush2.bf16.msra.mxu0 %v2153_v54 }
 0x1cc   : > { %985 = vmatprep.subr.bf16.mxu0 %v2152_v55 }
 0x1cf   : > { %986 = vmatpush2.bf16.msra.mxu0 %v2151_v58  ;;  %1406 = vmatpush1.bf16.xpose.msra.mxu1 %v2129_v49  ;;  %v2309_v49 = vld [vmem:[%s3013_s2] ss:$8 sps:$4 sm:$0xff]  }
 0x1d0   : > { %987 = vmatprep.subr.bf16.mxu0 %v2150_v56  ;;  %1407 = vmatprep.subr.bf16.mxu1 %v2128_v47  ;;  %v2312_v47 = vld [vmem:[%s3017_s6] sm:$0xff]  }
 0x1d3   : > { %988 = vmatpush2.bf16.msra.mxu0 %v2149_v60 }
 0x1d4   : > { %989 = vmatprep.subr.bf16.mxu0 %v2148_v34 }
 0x1d7   : > { %990 = vmatpush2.bf16.msra.mxu0 %v2147_v52  ;;  %1408 = vmatpush1.bf16.xpose.msra.mxu1 %v2127_v50  ;;  %v2402_v50 = vmov 0  }
 0x1d8   : > { %991 = vmatprep.subr.bf16.mxu0 %v2146_v53  ;;  %1409 = vmatprep.subr.bf16.mxu1 %v2126_v17  ;;  %v2313_v17 = vld [vmem:[%s3017_s6 + $0x8] sm:$0xff]  }
 0x1d9   : > { %2292 = vset.pattern.permute.xlu0 %v2402_v50  ;;  %2293 = vset.pattern.permute.xlu1 %v2402_v50 }
 0x1db   : > { %992 = vmatpush2.bf16.msra.mxu0 %v2145_v32 }
 0x1dc   : > { %993 = vmatprep.subr.bf16.mxu0 %v2144_v37 }
 0x1df   : > { %994 = vmatpush2.bf16.msra.mxu0 %v2143_v40  ;;  %1410 = vmatpush1.bf16.xpose.msra.mxu1 %v2125_v16  ;;  %v2314_v16 = vld [vmem:[%s3017_s6 + $0x10] sm:$0xff]  }
 0x1e0   : > { %995 = vmatprep.subr.bf16.mxu0 %v2142_v62  ;;  %1411 = vmatprep.subr.bf16.mxu1 %v2156_v42  ;;  %v1329_v42 = vld [vmem:[%s3018_s7] sm:$0xff] }
 0x1e1   : > { %1337 = vperm.xlu0 %2292, %v1329_v42  }
 0x1e3   : > { %996 = vmatpush2.bf16.msra.mxu0 %v2141_v59 }
 0x1e4   : > { %2174 = vmatprep.subr.msk.bf16.mxu0 %vm1171_vm5, %v2303_v46 }
 0x1e6   : > { %998 = vmatmul.mubr.bf16.vlgmr.msra.gmra.mxu0 %v2294_v33 }
 0x1e7   : > { %1007 = vmatprep.mubr.bf16.mxu0 %v2297_v35  ;;  %1412 = vmatpush2.bf16.xpose.msra.mxu1 %v2155_v48  ;;  %v1331_v48 = vld [vmem:[%s3018_s7 + $0x10] sm:$0xff] }
 0x1e8   : > { %1413 = vmatprep.subr.bf16.mxu1 %v2154_v51  ;;  %1189 = vmatpush1.bf16.msra.mxu0 %v1173_v44  ;;  %v1330_v51 = vld [vmem:[%s3018_s7 + $0x8] sm:$0xff] }
 0x1e9   : > { %1190 = vmatprep.subr.bf16.mxu0 %v2308_v36  ;;  %1347 = vperm.xlu1 %2293, %v1331_v48  }
 0x1ea   : > { %1342 = vperm.xlu0 %2292, %v1330_v51  }
 0x1ec   : > { %1191 = vmatpush1.bf16.msra.mxu0 %v2306_v61 }
 0x1ed   : > { %1192 = vmatprep.subr.bf16.mxu0 %v2311_v38 }
 0x1ee   : > { %1008 = vmatmul.mubr.bf16.gmra.mxu0 %v2299_v39 }
 0x1ef   : > { %1017 = vmatprep.mubr.bf16.mxu0 %v2300_v41  ;;  %1414 = vmatpush2.bf16.xpose.msra.mxu1 %v2153_v54  ;;  %v1332_v54 = vld [vmem:[%s3018_s7 + $0x18] sm:$0xff] }
 0x1f0   : > { %1415 = vmatprep.subr.bf16.mxu1 %v2152_v55  ;;  %1193 = vmatpush1.bf16.msra.mxu0 %v2309_v49  ;;  %v1333_v55 = vld [vmem:[%s3018_s7 + $0x20] sm:$0xff] }
 0x1f1   : > { %1352 = vperm.xlu1 %2293, %v1332_v54   ;;  %1357 = vperm.xlu0 %2292, %v1333_v55  }
 0x1f6   : > { %1018 = vmatmul.mubr.bf16.gmra.mxu0 %v2302_v45 }
 0x1f7   : > { %1416 = vmatpush2.bf16.xpose.msra.mxu1 %v2151_v58  ;;  %1210 = vmatprep.mubr.bf16.mxu0 %v2402_v50  ;;  %v1334_v58 = vld [vmem:[%s3018_s7 + $0x28] sm:$0xff] }
 0x1f8   : > { %1417 = vmatprep.subr.bf16.mxu1 %v2150_v56  ;;  %1362 = vperm.xlu1 %2293, %v1334_v58  }
 0x1fe   : > { %2175 = vmatmul.mubr.msk.bf16.vlgmr.msra.gmra.mxu0 %vm1161_vm6, %v2312_v47 }
 0x1ff   : > { %1418 = vmatpush2.bf16.xpose.msra.mxu1 %v2149_v60  ;;  %1220 = vmatprep.mubr.bf16.mxu0 %v2402_v50 }
 0x200   : > { %1419 = vmatprep.subr.bf16.mxu1 %v2148_v34 }
 0x206   : > { %2176 = vmatmul.mubr.msk.bf16.gmra.mxu0 %vm1161_vm6, %v2313_v17 }
 0x207   : > { %1420 = vmatpush2.bf16.xpose.msra.mxu1 %v2147_v52  ;;  %1230 = vmatprep.mubr.bf16.mxu0 %v2402_v50 }
 0x208   : > { %1421 = vmatprep.subr.bf16.mxu1 %v2146_v53 }
 0x20e   : > { %2177 = vmatmul.mubr.msk.bf16.gmra.mxu0 %vm1161_vm6, %v2314_v16 }
 0x20f   : > { %1422 = vmatpush2.bf16.xpose.msra.mxu1 %v2145_v32  ;;  %1298 = vmatprep.mubr.bf16.mxu0 %v2402_v50 }
 0x210   : > { %1423 = vmatprep.subr.bf16.mxu1 %v2144_v37 }
 0x217   : > { %1424 = vmatpush2.bf16.xpose.msra.mxu1 %v2143_v40 }
 0x218   : > { %1425 = vmatprep.subr.bf16.mxu1 %v2142_v62  ;;  %v1032_v62 = vlaneseq }
 0x21a   : > { %v1033_v35 = vshrl.u32 %v1032_v62, 7 }
 0x21c   : > { %v1034_v39 = vsub.s32 0, %v1033_v35 }
 0x21f   : > { %1426 = vmatpush2.bf16.xpose.msra.mxu1 %v2141_v59 }
 0x2a6   : > { %v999_v56 = vpop.f32.mrf.mxu0 }
 0x2a8   : > { %v1001_v60 = vpop.f32.mrf.mxu0 }
 0x2aa   : > { %v1003_v34 = vpop.f32.mrf.mxu0 }
 0x2ac   : > { %v1005_v52 = vpop.f32.mrf.mxu0 }
 0x2ae   : > { %v1009_v53 = vpop.f32.mrf.mxu0 }
 0x2b0   : > { %v1011_v32 = vpop.f32.mrf.mxu0 }
 0x2b2   : > { %v1013_v37 = vpop.f32.mrf.mxu0 }
 0x2b4   : > { %v1015_v40 = vpop.f32.mrf.mxu0 }
 0x2b6   : > { %v1019_v57 = vpop.f32.mrf.mxu0 }
 0x2b7   : > { %2318 = vrcp.f32 %v1019_v57  ;;  %vm1026_vm7 = vcmp.gt.f32.partialorder %v1019_v57, 0.0 }
 0x2b8   : > { %v1021_v43 = vpop.f32.mrf.mxu0 }
 0x2b9   : > { %2320 = vrcp.f32 %v1021_v43  ;;  %vm1027_vm8 = vcmp.gt.f32.partialorder %v1021_v43, 0.0 }
 0x2ba   : > { %v1023_v59 = vpop.f32.mrf.mxu0 }
 0x2bc   : > { %v1024_v33 = vpop.f32.mrf.mxu0 }
 0x2c4   : > { %v2319_v41 = vpop.eup %2318 }
 0x2c5   : > { %v1030_v45 = vsel %vm1026_vm7, %v2319_v41, 0.0 }
 0x2c6   : > { %v2321_v46 = vpop.eup %2320  ;;  %v1035_v63 = vrot.slane %v1030_v45, %v1034_v39 }
 0x2c7   : > { %v1031_v44 = vsel %vm1027_vm8, %v2321_v46, 0.0 }
 0x2c8   : > { %v1044_v36 = vmul.f32 %v1035_v63, %v1009_v53  ;;  %v1046_v61 = vmul.f32 %v1035_v63, %v1013_v37  ;;  %v2854_v38 = vmul.f32 %v1035_v63, %v999_v56  ;;  %v1039_v49 = vrot.slane %v1031_v44, %v1034_v39 }
 0x2c9   : > { %v2856_v47 = vmul.f32 %v1035_v63, %v1003_v34 }
 0x2ca   : > { %v1060_v17 = vmin.f32 %v1044_v36, 0.0  ;;  %v1062_v16 = vmin.f32 %v1046_v61, 0.0  ;;  %v1045_v42 = vmul.f32 %v1039_v49, %v1011_v32  ;;  %v1047_v48 = vmul.f32 %v1039_v49, %v1015_v40 }
 0x2cb   : > { %v1041_v54 = vmul.f32 %v1039_v49, %v1001_v60  ;;  %v1056_v55 = vmin.f32 %v2854_v38, 0.0  ;;  %v1058_v43 = vmin.f32 %v2856_v47, 0.0  ;;  %v1043_v53 = vmul.f32 %v1039_v49, %v1005_v52 }
 0x2cc   : > { %v1072_v51 = vmul.f32 1.442695, %v1060_v17  ;;  %v1076_v58 = vmul.f32 1.442695, %v1062_v16  ;;  %v1061_v57 = vmin.f32 %v1045_v42, 0.0  ;;  %v1063_v62 = vmin.f32 %v1047_v48, 0.0 }
 0x2cd   : > { %v1057_v37 = vmin.f32 %v1041_v54, 0.0  ;;  %v1059_v59 = vmin.f32 %v1043_v53, 0.0  ;;  %v1064_v33 = vmul.f32 1.442695, %v1056_v55  ;;  %v1068_v40 = vmul.f32 1.442695, %v1058_v43 }
 0x2ce   : > { %2322 = vpow2.f32 %v1072_v51  ;;  %v1074_v56 = vmul.f32 1.442695, %v1061_v57  ;;  %v1078_v34 = vmul.f32 1.442695, %v1063_v62  ;;  %vm1052_vm9 = vcmp.gt.f32.partialorder %v1044_v36, 0.0 }
 0x2cf   : > { %2324 = vpow2.f32 %v1076_v58  ;;  %v1066_v32 = vmul.f32 1.442695, %v1057_v37  ;;  %v1070_v60 = vmul.f32 1.442695, %v1059_v59  ;;  %vm1053_vm10 = vcmp.gt.f32.partialorder %v1045_v42, 0.0 }
 0x2d0   : > { %2326 = vpow2.f32 %v1074_v56  ;;  %vm1055_vm11 = vcmp.gt.f32.partialorder %v1047_v48, 0.0  ;;  %vm1054_vm12 = vcmp.gt.f32.partialorder %v1046_v61, 0.0  ;;  %vm1049_vm13 = vcmp.gt.f32.partialorder %v1041_v54, 0.0 }
 0x2d1   : > { %2328 = vpow2.f32 %v1078_v34  ;;  %vm1051_vm14 = vcmp.gt.f32.partialorder %v1043_v53, 0.0  ;;  %vm1048_vm15 = vcmp.gt.f32.partialorder %v2854_v38, 0.0  ;;  %vm1050_vm0 = vcmp.gt.f32.partialorder %v2856_v47, 0.0 }
 0x2d2   : > { %2330 = vpow2.f32 %v1066_v32 }
 0x2d3   : > { %2332 = vpow2.f32 %v1070_v60 }
 0x2d4   : > { %2334 = vpow2.f32 %v1064_v33 }
 0x2d5   : > { %2336 = vpow2.f32 %v1068_v40 }
 0x2db   : > { %v2323_v35 = vpop.eup %2322 }
 0x2dc   : > { %v2325_v39 = vpop.eup %2324  ;;  %v2161_v41 = vadd.f32 -1.0, %v2323_v35 }
 0x2dd   : > { %v2163_v45 = vadd.f32 -1.0, %v2325_v39  ;;  %v2327_v52 = vpop.eup %2326 }
 0x2de   : > { %v2329_v46 = vpop.eup %2328  ;;  %v2162_v63 = vadd.f32 -1.0, %v2327_v52  ;;  %v1092_v51 = vsel %vm1052_vm9, %v1044_v36, %v2161_v41 }
 0x2df   : > { %v2331_v44 = vpop.eup %2330  ;;  %v2164_v49 = vadd.f32 -1.0, %v2329_v46  ;;  %v1094_v55 = vsel %vm1054_vm12, %v1046_v61, %v2163_v45 }
 0x2e0   : > { %v2333_v17 = vpop.eup %2332  ;;  %v1093_v16 = vsel %vm1053_vm10, %v1045_v42, %v2162_v63  ;;  %v2158_v58 = vadd.f32 -1.0, %v2331_v44  ;;  %v1098_v33 = vpack.c.bf16 %v1094_v55, %v1092_v51  ;;  %v1338_v51 = vpop.permute.xlu0 %1337 }
 0x2e1   : > { %v2335_v57 = vpop.eup %2334  ;;  %v1095_v43 = vsel %vm1055_vm11, %v1047_v48, %v2164_v49  ;;  %v2160_v62 = vadd.f32 -1.0, %v2333_v17  ;;  %v2315_v48 = vld [vmem:[%s3016_s5] sm:$0xff]  }
 0x2e2   : > { %v2337_v56 = vpop.eup %2336  ;;  %v1099_v37 = vpack.c.bf16 %v1095_v43, %v1093_v16  ;;  %v1089_v34 = vsel %vm1049_vm13, %v1041_v54, %v2158_v58  ;;  %v2157_v59 = vadd.f32 -1.0, %v2335_v57  ;;  %v2316_v54 = vld [vmem:[%s3016_s5 + $0x8] sm:$0xff]  }
 0x2e3   : > { %v1091_v32 = vsel %vm1051_vm14, %v1043_v53, %v2160_v62  ;;  %v2159_v40 = vadd.f32 -1.0, %v2337_v56 }
 0x2e4   : > { %1278 = vmatprep.subr.bf16.mxu0 %v1099_v37  ;;  %v1097_v60 = vpack.c.bf16 %v1091_v32, %v1089_v34  ;;  %v1088_v36 = vsel %vm1048_vm15, %v2854_v38, %v2157_v59  ;;  %v2317_v38 = vld [vmem:[%s3016_s5 + $0x10] sm:$0xff]   ;;  %v1343_v56 = vpop.permute.xlu0 %1342 }
 0x2e5   : > { %1279 = vmatpush1.bf16.msra.mxu0 %v1098_v33  ;;  %v1090_v61 = vsel %vm1050_vm0, %v2856_v47, %v2159_v40  ;;  %v1212_v47 = vpop.f32.mrf.mxu0  ;;  %v1348_v33 = vpop.permute.xlu1 %1347 }
 0x2e6   : > { %1280 = vmatprep.subr.bf16.mxu0 %v1097_v60  ;;  %v1096_v42 = vpack.c.bf16 %v1090_v61, %v1088_v36 }
 0x2e7   : > { %v1214_v53 = vpop.f32.mrf.mxu0 }
 0x2e9   : > { %1281 = vmatpush1.bf16.msra.mxu0 %v1096_v42  ;;  %v1216_v35 = vpop.f32.mrf.mxu0 }
 0x2eb   : > { %v1218_v39 = vpop.f32.mrf.mxu0 }
 0x2ec   : > { %2181 = vmatmul.mubr.msk.bf16.vlgmr.msra.gmra.mxu0 %vm1256_vm1, %v2315_v48 }
 0x2ed   : > { %1308 = vmatprep.mubr.bf16.mxu0 %v2402_v50  ;;  %v1222_v41 = vpop.f32.mrf.mxu0 }
 0x2ef   : > { %v1224_v45 = vpop.f32.mrf.mxu0 }
 0x2f1   : > { %v1226_v52 = vpop.f32.mrf.mxu0 }
 0x2f3   : > { %v1228_v46 = vpop.f32.mrf.mxu0 }
 0x2f4   : > { %2182 = vmatmul.mubr.msk.bf16.gmra.mxu0 %vm1256_vm1, %v2316_v54 }
 0x2f5   : > { %1318 = vmatprep.mubr.bf16.mxu0 %v2402_v50  ;;  %v1232_v63 = vpop.f32.mrf.mxu0 }
 0x2f7   : > { %v1234_v44 = vpop.f32.mrf.mxu0 }
 0x2f9   : > { %v1236_v49 = vpop.f32.mrf.mxu0 }
 0x2fb   : > { %v1238_v17 = vpop.f32.mrf.mxu0 }
 0x2fc   : > { %2183 = vmatmul.mubr.msk.bf16.gmra.mxu0 %vm1256_vm1, %v2317_v38 }
 0x3ac   : > { %v1300_v16 = vpop.f32.mrf.mxu0 }
 0x3ad   : > { %v1301_v43 = vadd.f32 %v1300_v16, %v1212_v47  ;;  %v1353_v47 = vpop.permute.xlu1 %1352 }
 0x3ae   : > { %v1302_v50 = vpop.f32.mrf.mxu0 }
 0x3af   : > { %v1303_v58 = vadd.f32 %v1302_v50, %v1214_v53  ;;  %v1365_v60 = vadd.f32 %v1338_v51, %v1301_v43 }
 0x3b0   : > { %v1304_v55 = vpop.f32.mrf.mxu0 }
 0x3b1   : > { %v1305_v57 = vadd.f32 %v1304_v55, %v1216_v35  ;;  %v1366_v32 = vadd.f32 %v1338_v51, %v1303_v58 }
 0x3b2   : > { %v1306_v62 = vpop.f32.mrf.mxu0 }
 0x3b3   : > { %v1307_v37 = vadd.f32 %v1306_v62, %v1218_v39  ;;  %v1367_v34 = vadd.f32 %v1343_v56, %v1305_v57 }
 0x3b4   : > { %v1310_v59 = vpop.f32.mrf.mxu0 }
 0x3b5   : > { %v1368_v40 = vadd.f32 %v1343_v56, %v1307_v37  ;;  %v1377_v42 = vpack.c.bf16 %v1367_v34, %v1365_v60  ;;  %v1311_v18 = vadd.f32 %v1310_v59, %v1222_v41  ;;  %v1363_v41 = vpop.permute.xlu1 %1362  ;;  %v1358_v59 = vpop.permute.xlu0 %1357 }
 0x3b6   : > { %v1312_v36 = vpop.f32.mrf.mxu0 }
 0x3b7   : > { %v1378_v61 = vpack.c.bf16 %v1368_v40, %v1366_v32  ;;  %v1313_v54 = vadd.f32 %v1312_v36, %v1224_v45  ;;  %v1369_v57 = vadd.f32 %v1348_v33, %v1311_v18  ;;  %v1383_v18 = vld [vmem:[#allocation4] sm:$0xff] }
 0x3b8   : > { %v1314_v48 = vpop.f32.mrf.mxu0 }
 0x3b9   : > { %v1315_v38 = vadd.f32 %v1314_v48, %v1226_v52  ;;  %1427 = vmatprep.mubr.bf16.mxu1 %v1378_v61  ;;  %v1370_v50 = vadd.f32 %v1348_v33, %v1313_v54  ;;  %v1385_v48 = vld [vmem:[#allocation4 + $0x10] sm:$0xff] }
 0x3ba   : > { %v1316_v53 = vpop.f32.mrf.mxu0  ;;  %1428 = vmatmul.mubr.bf16.vlgmr.msra.gmra.mxu1 %v1377_v42  ;;  %v1384_v42 = vld [vmem:[#allocation4 + $0x8] sm:$0xff] }
 0x3bb   : > { %v1317_v35 = vadd.f32 %v1316_v53, %v1228_v46  ;;  %v1371_v16 = vadd.f32 %v1353_v47, %v1315_v38  ;;  %v1386_v38 = vld [vmem:[#allocation4 + $0x18] sm:$0xff] }
 0x3bc   : > { %v1320_v39 = vpop.f32.mrf.mxu0 }
 0x3bd   : > { %v1372_v55 = vadd.f32 %v1353_v47, %v1317_v35  ;;  %v1379_v51 = vpack.c.bf16 %v1371_v16, %v1369_v57  ;;  %v1321_v45 = vadd.f32 %v1320_v39, %v1232_v63  ;;  %v1387_v47 = vld [vmem:[#allocation4 + $0x20] sm:$0xff]  ;;  %v1388_v39 = vld [vmem:[#allocation4 + $0x28] sm:$0xff]  ;;  %v1389_v57 = vld [vmem:[#allocation4 + $0x30] sm:$0xff] }
 0x3be   : > { %v1322_v58 = vpop.f32.mrf.mxu0 }
 0x3bf   : > { %v1380_v62 = vpack.c.bf16 %v1372_v55, %v1370_v50  ;;  %v1323_v56 = vadd.f32 %v1322_v58, %v1234_v44  ;;  %v1373_v60 = vadd.f32 %v1358_v59, %v1321_v45 }
 0x3c0   : > { %v1324_v43 = vpop.f32.mrf.mxu0 }
 0x3c1   : > { %v1325_v37 = vadd.f32 %v1324_v43, %v1236_v49  ;;  %1437 = vmatprep.mubr.bf16.mxu1 %v1380_v62  ;;  %v1374_v46 = vadd.f32 %v1358_v59, %v1323_v56 }
 0x3c2   : > { %v1326_v52 = vpop.f32.mrf.mxu0  ;;  %1438 = vmatmul.mubr.bf16.gmra.mxu1 %v1379_v51  ;;  %v1390_v51 = vld [vmem:[#allocation4 + $0x38] sm:$0xff] }
 0x3c3   : > { %v1327_v34 = vadd.f32 %v1326_v52, %v1238_v17  ;;  %v1375_v32 = vadd.f32 %v1363_v41, %v1325_v37  ;;  %v1391_v37 = vld [vmem:[#allocation4 + $0x40] sm:$0xff] }
 0x3c5   : > { %v1376_v40 = vadd.f32 %v1363_v41, %v1327_v34  ;;  %v1381_v61 = vpack.c.bf16 %v1375_v32, %v1373_v60  ;;  %v1392_v41 = vld [vmem:[#allocation4 + $0x48] sm:$0xff]  ;;  %v1393_v32 = vld [vmem:[#allocation4 + $0x50] sm:$0xff]  ;;  %v1394_v60 = vld [vmem:[#allocation4 + $0x58] sm:$0xff] }
 0x3c7   : > { %v1382_v36 = vpack.c.bf16 %v1376_v40, %v1374_v46 }
 0x3c9   : > { %1447 = vmatprep.mubr.bf16.mxu1 %v1382_v36 }
 0x3ca   : > { %1448 = vmatmul.mubr.bf16.gmra.mxu1 %v1381_v61 }
 0x47a   : > { %v1429_v33 = vpop.f32.mrf.mxu1 }
 0x47b   : > { %v1458_v44 = vadd.f32 %v1429_v33, %v1383_v18 }
 0x47c   : > { %v1431_v49 = vpop.f32.mrf.mxu1 }
 0x47d   : > { %1470 = vst [vmem:[#allocation4] sm:$0xff] %v1458_v44  ;;  %v1459_v63 = vadd.f32 %v1431_v49, %v1384_v42 }
 0x47e   : > { %v1433_v54 = vpop.f32.mrf.mxu1 }
 0x47f   : > { %1471 = vst [vmem:[#allocation4 + $0x8] sm:$0xff] %v1459_v63  ;;  %v1460_v17 = vadd.f32 %v1433_v54, %v1385_v48 }
 0x480   : > { %v1435_v53 = vpop.f32.mrf.mxu1 }
 0x481   : > { %1472 = vst [vmem:[#allocation4 + $0x10] sm:$0xff] %v1460_v17  ;;  %v1461_v35 = vadd.f32 %v1435_v53, %v1386_v38 }
 0x482   : > { %v1439_v16 = vpop.f32.mrf.mxu1 }
 0x483   : > { %1473 = vst [vmem:[#allocation4 + $0x18] sm:$0xff] %v1461_v35  ;;  %v1462_v50 = vadd.f32 %v1439_v16, %v1387_v47 }
 0x484   : > { %v1441_v55 = vpop.f32.mrf.mxu1 }
 0x485   : > { %1474 = vst [vmem:[#allocation4 + $0x20] sm:$0xff] %v1462_v50  ;;  %v1463_v58 = vadd.f32 %v1441_v55, %v1388_v39 }
 0x486   : > { %v1443_v62 = vpop.f32.mrf.mxu1 }
 0x487   : > { %1475 = vst [vmem:[#allocation4 + $0x28] sm:$0xff] %v1463_v58  ;;  %v1464_v43 = vadd.f32 %v1443_v62, %v1389_v57 }
 0x488   : > { %v1445_v56 = vpop.f32.mrf.mxu1 }
 0x489   : > { %1476 = vst [vmem:[#allocation4 + $0x30] sm:$0xff] %v1464_v43  ;;  %v1465_v45 = vadd.f32 %v1445_v56, %v1390_v51 }
 0x48a   : > { %v1449_v52 = vpop.f32.mrf.mxu1 }
 0x48b   : > { %1477 = vst [vmem:[#allocation4 + $0x38] sm:$0xff] %v1465_v45  ;;  %v1466_v34 = vadd.f32 %v1449_v52, %v1391_v37 }
 0x48c   : > { %v1451_v59 = vpop.f32.mrf.mxu1 }
 0x48d   : > { %1478 = vst [vmem:[#allocation4 + $0x40] sm:$0xff] %v1466_v34  ;;  %v1467_v46 = vadd.f32 %v1451_v59, %v1392_v41 }
 0x48e   : > { %v1453_v40 = vpop.f32.mrf.mxu1 }
 0x48f   : > { %1479 = vst [vmem:[#allocation4 + $0x48] sm:$0xff] %v1467_v46  ;;  %v1468_v36 = vadd.f32 %v1453_v40, %v1393_v32 }
 0x490   : > { %v1455_v61 = vpop.f32.mrf.mxu1 }
 0x491   : > { %1480 = vst [vmem:[#allocation4 + $0x50] sm:$0xff] %v1468_v36  ;;  %v1469_v18 = vadd.f32 %v1455_v61, %v1394_v60 }
 0x493   : > { %1481 = vst [vmem:[#allocation4 + $0x58] sm:$0xff] %v1469_v18 }
 0x494 PF: > { %1483 = sbr.rel (!%p428_p4) target bundleno = 1438 (0x59e), region = 72  ;;  %v2403_v42 = vmov (%p428_p4), 0   ;;  %v1498_v44 = vlaneseq (%p428_p4)  ;;  %v1586_v49 = vld [vmem:[%s3020_s9] sm:$0xff] (%p428_p4)  ;;  %v1587_v63 = vld [vmem:[%s3020_s9 + $0x8] sm:$0xff] (%p428_p4)  ;;  %v1494_v53 = vld [vmem:[#allocation4 + $0x28] sm:$0xff] (%p428_p4)  ;;  %vm1603_vm11 = vcmask (%p428_p4), 261120  }
 0x495   : > { %1639 = vmatprep.mubr.bf16.mxu0 (%p428_p4), %v2403_v42  ;;  %2338 = vset.pattern.permute.xlu0 (%p428_p4), %v2403_v42  ;;  %v1496_v35 = vld [vmem:[#allocation4 + $0x38] sm:$0xff] (%p428_p4)  ;;  %v1493_v16 = vld [vmem:[#allocation4 + $0x20] sm:$0xff] (%p428_p4)  ;;  %v1495_v39 = vld [vmem:[#allocation4 + $0x30] sm:$0xff] (%p428_p4)  ;;  %vm1687_vm12 = vcmask (%p428_p4), 1042434   ;;  %vm1688_vm13 = vsmask.f32 (%p428_p4), 7946 }
 0x496   : > { %v2877_v33 = vld [vmem:[#allocation4 + $0x40] ss:$8 sm:$0x3] (%p428_p4)  ;;  %1590 = vperm.xlu0 (%p428_p4), %2338, %v1586_v49   ;;  %v2883_v48 = vshrl.u32 (%p428_p4), %v1498_v44, 7  ;;  %v1492_v58 = vld [vmem:[#allocation4 + $0x18] sm:$0xff] (%p428_p4)  ;;  %v1491_v45 = vld [vmem:[#allocation4 + $0x10] sm:$0xff] (%p428_p4) }
 0x497   : > { %2340 = vrcp.f32 (%p428_p4), %v2877_v33  ;;  %vm1486_vm2 = vcmp.gt.f32.partialorder (%p428_p4), %v2877_v33, 0.0  ;;  %v1490_v57 = vld [vmem:[#allocation4 + $0x8] sm:$0xff] (%p428_p4)  ;;  %v1489_v62 = vld [vmem:[#allocation4] sm:$0xff] (%p428_p4)  ;;  %vm1690_vm14 = vcmask (%p428_p4), 1046534   ;;  %vm1691_vm15 = vsmask.f32 (%p428_p4), 7962  ;;  %vm1689_vm0 = vmand (%p428_p4), %vm1687_vm12, %vm1688_vm13 }
 0x498   : > { %v1504_v54 = vsub.s32 (%p428_p4), 1, %v2883_v48  ;;  %v1500_v38 = vsub.s32 (%p428_p4), 0, %v2883_v48  ;;  %vm1692_vm1 = vmand (%p428_p4), %vm1690_vm14, %vm1691_vm15 }
 0x49a   : > { %1595 = vperm.xlu0 %2338, %v1587_v63  }
 0x4a4   : > { %v2341_v17 = vpop.eup %2340 }
 0x4a5   : > { %v1488_v47 = vsel %vm1486_vm2, %v2341_v17, 0.0  ;;  %vm1693_vm2 = vmor %vm1692_vm1, %vm1689_vm0 }
 0x4a6   : > { %v1505_v50 = vrot.slane %v1488_v47, %v1504_v54  ;;  %v1501_v55 = vrot.slane %v1488_v47, %v1500_v38 }
 0x4a8   : > { %v1513_v51 = vmul.f32 %v1505_v50, %v1494_v53  ;;  %v1515_v43 = vmul.f32 %v1505_v50, %v1496_v35  ;;  %v1512_v56 = vmul.f32 %v1501_v55, %v1493_v16  ;;  %v1514_v37 = vmul.f32 %v1501_v55, %v1495_v39 }
 0x4a9   : > { %v2895_v52 = vmul.f32 %v1505_v50, %v1490_v57  ;;  %v2897_v41 = vmul.f32 %v1505_v50, %v1492_v58  ;;  %v2899_v32 = vmul.f32 %v1501_v55, %v1489_v62  ;;  %v2901_v60 = vmul.f32 %v1501_v55, %v1491_v45  ;;  %v1569_v57 = vld [vmem:[#allocation3 + $0x30] sm:$0xff]  ;;  %v1571_v45 = vld [vmem:[#allocation3 + $0x38] sm:$0xff] }
 0x4aa   : > { %v1529_v34 = vmin.f32 %v1513_v51, 0.0  ;;  %v1531_v59 = vmin.f32 %v1515_v43, 0.0  ;;  %v1528_v46 = vmin.f32 %v1512_v56, 0.0  ;;  %v1530_v40 = vmin.f32 %v1514_v37, 0.0 }
 0x4ab   : > { %v1525_v44 = vmin.f32 %v2895_v52, 0.0  ;;  %v1527_v49 = vmin.f32 %v2897_v41, 0.0  ;;  %v1524_v63 = vmin.f32 %v2899_v32, 0.0  ;;  %v1526_v47 = vmin.f32 %v2901_v60, 0.0 }
 0x4ac   : > { %v1542_v36 = vmul.f32 1.442695, %v1529_v34  ;;  %v1546_v61 = vmul.f32 1.442695, %v1531_v59  ;;  %v1540_v18 = vmul.f32 1.442695, %v1528_v46 }
 0x4ad   : > { %v1544_v42 = vmul.f32 1.442695, %v1530_v40  ;;  %v1534_v17 = vmul.f32 1.442695, %v1525_v44  ;;  %v1538_v53 = vmul.f32 1.442695, %v1527_v49 }
 0x4ae   : > { %2342 = vpow2.f32 %v1542_v36  ;;  %v1532_v35 = vmul.f32 1.442695, %v1524_v63  ;;  %v1536_v16 = vmul.f32 1.442695, %v1526_v47  ;;  %vm1521_vm3 = vcmp.gt.f32.partialorder %v1513_v51, 0.0  ;;  %v1568_v40 = vld [vmem:[#allocation3 + $0x28] sm:$0xff] }
 0x4af   : > { %2344 = vpow2.f32 %v1546_v61  ;;  %vm1523_vm4 = vcmp.gt.f32.partialorder %v1515_v43, 0.0  ;;  %vm1520_vm5 = vcmp.gt.f32.partialorder %v1512_v56, 0.0  ;;  %vm1522_vm6 = vcmp.gt.f32.partialorder %v1514_v37, 0.0  ;;  %v1570_v44 = vld [vmem:[#allocation3 + $0x10] sm:$0xff]  ;;  %v1565_v47 = vld [vmem:[#allocation3 + $0x8] sm:$0xff] }
 0x4b0   : > { %2346 = vpow2.f32 %v1540_v18  ;;  %vm1517_vm7 = vcmp.gt.f32.partialorder %v2895_v52, 0.0  ;;  %vm1519_vm8 = vcmp.gt.f32.partialorder %v2897_v41, 0.0  ;;  %vm1516_vm9 = vcmp.gt.f32.partialorder %v2899_v32, 0.0 }
 0x4b1   : > { %2348 = vpow2.f32 %v1544_v42  ;;  %vm1518_vm10 = vcmp.gt.f32.partialorder %v2901_v60, 0.0 }
 0x4b2   : > { %2350 = vpow2.f32 %v1534_v17 }
 0x4b3   : > { %2352 = vpow2.f32 %v1538_v53 }
 0x4b4   : > { %2354 = vpow2.f32 %v1532_v35 }
 0x4b5   : > { %2356 = vpow2.f32 %v1536_v16 }
 0x4bb   : > { %v2343_v39 = vpop.eup %2342 }
 0x4bc   : > { %v2345_v50 = vpop.eup %2344  ;;  %v2189_v55 = vadd.f32 -1.0, %v2343_v39 }
 0x4bd   : > { %v2347_v58 = vpop.eup %2346  ;;  %v2191_v62 = vadd.f32 -1.0, %v2345_v50  ;;  %v1567_v50 = vld [vmem:[#allocation3 + $0x18] sm:$0xff] }
 0x4be   : > { %v2349_v34 = vpop.eup %2348  ;;  %v1561_v59 = vsel %vm1521_vm3, %v1513_v51, %v2189_v55  ;;  %v2188_v46 = vadd.f32 -1.0, %v2347_v58 }
 0x4bf   : > { %v2351_v36 = vpop.eup %2350  ;;  %v1563_v61 = vsel %vm1523_vm4, %v1515_v43, %v2191_v62  ;;  %v1577_v18 = vadd.f32 %v1569_v57, %v1561_v59  ;;  %v2190_v42 = vadd.f32 -1.0, %v2349_v34  ;;  %v1564_v62 = vld [vmem:[#allocation3] sm:$0xff] }
 0x4c0   : > { %v2353_v49 = vpop.eup %2352  ;;  %v1579_v63 = vadd.f32 %v1571_v45, %v1563_v61  ;;  %v1560_v17 = vsel %vm1520_vm5, %v1512_v56, %v2188_v46  ;;  %v2185_v53 = vadd.f32 -1.0, %v2351_v36  ;;  %v1566_v59 = vld [vmem:[#allocation3 + $0x20] sm:$0xff] }
 0x4c1   : > { %v2355_v51 = vpop.eup %2354  ;;  %v1562_v35 = vsel %vm1522_vm6, %v1514_v37, %v2190_v42  ;;  %v1576_v16 = vadd.f32 %v1568_v40, %v1560_v17  ;;  %v2187_v39 = vadd.f32 -1.0, %v2353_v49  ;;  %v2404_v49 = vmov 0.0  }
 0x4c2   : > { %v2357_v43 = vpop.eup %2356  ;;  %v1585_v55 = vpack.c.bf16 %v1579_v63, %v1577_v18  ;;  %v1578_v57 = vadd.f32 %v1570_v44, %v1562_v35  ;;  %v1557_v58 = vsel %vm1517_vm7, %v2895_v52, %v2185_v53  ;;  %v2184_v56 = vadd.f32 -1.0, %v2355_v51  ;;  %1697 = vst [vmem:[#allocation6] sm:$0xff] %v2404_v49 }
 0x4c3   : > { %v1559_v45 = vsel %vm1519_vm8, %v2897_v41, %v2187_v39  ;;  %v1573_v34 = vadd.f32 %v1565_v47, %v1557_v58  ;;  %v2186_v37 = vadd.f32 -1.0, %v2357_v43  ;;  %v2339_v41 = vld [vmem:[%s3019_s8] sm:$0xff]  }
 0x4c4   : > { %1619 = vmatprep.subr.bf16.mxu0 %v1585_v55  ;;  %v1584_v46 = vpack.c.bf16 %v1578_v57, %v1576_v16  ;;  %v1575_v40 = vadd.f32 %v1567_v50, %v1559_v45  ;;  %v1556_v36 = vsel %vm1516_vm9, %v2899_v32, %v2184_v56  ;;  %v1668_v32 = vrot.slane %v2877_v33, %v1500_v38 }
 0x4c5   : > { %v1558_v61 = vsel %vm1518_vm10, %v2901_v60, %v2186_v37  ;;  %v1572_v18 = vadd.f32 %v1564_v62, %v1556_v36  ;;  %v1672_v60 = vrot.slane %v2877_v33, %v1504_v54 }
 0x4c6   : > { %1620 = vmatpush1.bf16.msra.mxu0 %v1584_v46  ;;  %v1583_v52 = vpack.c.bf16 %v1575_v40, %v1573_v34  ;;  %v1574_v42 = vadd.f32 %v1566_v59, %v1558_v61 }
 0x4c7   : > { %v2244_v35 = vpack.c.bf16 %v1672_v60, %v1668_v32 }
 0x4c8   : > { %1621 = vmatprep.subr.bf16.mxu0 %v1583_v52  ;;  %v1582_v44 = vpack.c.bf16 %v1574_v42, %v1572_v18 }
 0x4c9   : > { %v1683_v38 = vshll.u32 %v2244_v35, 16 }
 0x4ca   : > { %1622 = vmatpush1.bf16.msra.mxu0 %v1582_v44 }
 0x4cb   : > { %v1685_v54 = vrot.slane %v1683_v38, 6 }
 0x4cd   : > { %2193 = vmatmul.mubr.msk.bf16.vlgmr.msra.gmra.mxu0 %vm1603_vm11, %v2339_v41 }
 0x511   : > { %v1591_v63 = vpop.permute.xlu0 %1590 }
 0x515   : > { %v1596_v50 = vpop.permute.xlu0 %1595 }
 0x58d   : > { %v1641_v17 = vpop.f32.mrf.mxu0 }
 0x58e   : > { %v1642_v47 = vadd.f32 %v1641_v17, %v1591_v63 }
 0x58f   : > { %v1643_v53 = vpop.f32.mrf.mxu0 }
 0x590   : > { %v1644_v51 = vadd.f32 %v1643_v53, %v1591_v63 }
 0x591   : > { %v1645_v16 = vpop.f32.mrf.mxu0 }
 0x592   : > { %v2242_v39 = vpack.c.bf16 %v1644_v51, %v1642_v47  ;;  %v1646_v55 = vadd.f32 %v1645_v16, %v1596_v50 }
 0x593   : > { %v1647_v43 = vpop.f32.mrf.mxu0 }
 0x594   : > { %1662 = vst [vmem:[#allocation5] sm:$0xff] %v2242_v39  ;;  %v1648_v48 = vadd.f32 %v1647_v43, %v1596_v50 }
 0x596   : > { %v2243_v33 = vpack.c.bf16 %v1648_v48, %v1646_v55 }
 0x598   : > { %1663 = vst [vmem:[#allocation5 + $0x8] sm:$0xff] %v2243_v33 }
 0x59b   : > { %v1694_v57 = vld [vmem:[#allocation5] sm:$0x44] }
 0x59c   : > { %v1695_v58 = vsel %vm1693_vm2, %v1685_v54, %v1694_v57 }
 0x59d   : > { %1696 = vst [vmem:[#allocation5] sm:$0x44] %v1695_v58 }
 0x59e PF: > { %p1698_p6 = scmp.eq.s32.totalorder %s2390_s13, 1  ;;  %p2197_p7 = scmp.ne.s32.totalorder %s2390_s13, 1 }
 0x5a0   : > { %1701 = sbr.rel (%p2197_p7) target bundleno = 1952 (0x7a0), region = 76 }
 0x5a5   : > { %v2215_v56 = vcombine.high %v2554_v14, %v2559_v15  ;;  %v2214_v62 = vcombine.low %v2554_v14, %v2559_v15  ;;  %v2213_v45 = vcombine.high %v2544_v12, %v2549_v13  ;;  %v2360_v34 = vld [vmem:[#allocation5 + $0x4] ss:$8 sps:$4 sm:$0xff]   ;;  %v2212_v37 = vcombine.low %v2544_v12, %v2549_v13 }
 0x5a6   : > { %v2211_v59 = vcombine.high %v2534_v10, %v2539_v11  ;;  %1906 = vmatprep.mubr.bf16.mxu0 %v2360_v34  ;;  %v2210_v46 = vcombine.low %v2534_v10, %v2539_v11  ;;  %v2209_v14 = vcombine.high %v2524_v8, %v2529_v9  ;;  %v2208_v12 = vcombine.low %v2524_v8, %v2529_v9 }
 0x5a7   : > { %1874 = vmatprep.subr.bf16.mxu0 %v2215_v56  ;;  %1960 = vmatprep.subr.bf16.mxu1 %v2215_v56  ;;  %v2207_v13 = vcombine.high %v2514_v6, %v2519_v7  ;;  %v2206_v15 = vcombine.low %v2514_v6, %v2519_v7  ;;  %v2205_v10 = vcombine.high %v2504_v4, %v2509_v5  ;;  %v1947_v53 = vlaneseq }
 0x5a8   : > { %1875 = vmatpush1.bf16.msra.mxu0 %v2214_v62  ;;  %1961 = vmatpush1.bf16.xpose.msra.mxu1 %v2214_v62  ;;  %v2204_v11 = vcombine.low %v2504_v4, %v2509_v5  ;;  %v2203_v8 = vcombine.high %v2493_v2, %v2499_v3  ;;  %v2202_v9 = vcombine.low %v2493_v2, %v2499_v3 }
 0x5a9   : > { %1876 = vmatprep.subr.bf16.mxu0 %v2213_v45  ;;  %1962 = vmatprep.subr.bf16.mxu1 %v2213_v45  ;;  %v2201_v6 = vcombine.high %v2483_v0, %v2488_v1  ;;  %v2200_v7 = vcombine.low %v2483_v0, %v2488_v1  ;;  %v2231_v4 = vcombine.high %v2634_v30, %v2639_v31  ;;  %v1948_v47 = vshrl.u32 %v1947_v53, 7 }
 0x5aa   : > { %v2230_v5 = vcombine.low %v2634_v30, %v2639_v31  ;;  %v2229_v2 = vcombine.high %v2624_v28, %v2629_v29  ;;  %v2228_v3 = vcombine.low %v2624_v28, %v2629_v29  ;;  %v2227_v0 = vcombine.high %v2614_v26, %v2619_v27 }
 0x5ab   : > { %v2226_v1 = vcombine.low %v2614_v26, %v2619_v27  ;;  %v2225_v30 = vcombine.high %v2604_v24, %v2609_v25  ;;  %v2224_v31 = vcombine.low %v2604_v24, %v2609_v25  ;;  %v2223_v28 = vcombine.high %v2594_v22, %v2599_v23  ;;  %v3033_v24 = vld [vmem:[#allocation9_spill] sm:$0xff] }
 0x5ac   : > { %1877 = vmatpush1.bf16.msra.mxu0 %v2212_v37  ;;  %v2222_v29 = vcombine.low %v2594_v22, %v2599_v23  ;;  %v2221_v26 = vcombine.high %v2584_v20, %v2589_v21  ;;  %v2220_v27 = vcombine.low %v2584_v20, %v2589_v21  ;;  %v2219_v25 = vcombine.high %v3033_v24, %v2579_v19  ;;  %v3034_v22 = vld [vmem:[#allocation8_spill] sm:$0xff]  ;;  %v3035_v23 = vld [vmem:[#allocation7_spill] sm:$0xff] }
 0x5ad   : > { %1878 = vmatprep.subr.bf16.mxu0 %v2211_v59  ;;  %v2218_v40 = vcombine.low %v3033_v24, %v2579_v19  ;;  %v2217_v36 = vcombine.high %v3035_v23, %v3034_v22  ;;  %v2216_v61 = vcombine.low %v3035_v23, %v3034_v22  ;;  %v2358_v20 = vld [vmem:[#allocation5] ss:$8 sps:$4 sm:$0xff]   ;;  %v1949_v43 = vsub.s32 4, %v1948_v47 }
 0x5b0   : > { %1879 = vmatpush1.bf16.msra.mxu0 %v2210_v46  ;;  %1963 = vmatpush1.bf16.xpose.msra.mxu1 %v2212_v37 }
 0x5b1   : > { %1880 = vmatprep.subr.bf16.mxu0 %v2209_v14  ;;  %1964 = vmatprep.subr.bf16.mxu1 %v2211_v59 }
 0x5b4   : > { %1881 = vmatpush1.bf16.msra.mxu0 %v2208_v12 }
 0x5b5   : > { %1882 = vmatprep.subr.bf16.mxu0 %v2207_v13 }
 0x5b8   : > { %1883 = vmatpush1.bf16.msra.mxu0 %v2206_v15  ;;  %1965 = vmatpush1.bf16.xpose.msra.mxu1 %v2210_v46 }
 0x5b9   : > { %1884 = vmatprep.subr.bf16.mxu0 %v2205_v10  ;;  %1966 = vmatprep.subr.bf16.mxu1 %v2209_v14  ;;  %v1959_v14 = vld [vmem:[#allocation6] sm:$0xff] }
 0x5bc   : > { %1885 = vmatpush1.bf16.msra.mxu0 %v2204_v11 }
 0x5bd   : > { %1886 = vmatprep.subr.bf16.mxu0 %v2203_v8 }
 0x5c0   : > { %1887 = vmatpush1.bf16.msra.mxu0 %v2202_v9  ;;  %1967 = vmatpush1.bf16.xpose.msra.mxu1 %v2208_v12 }
 0x5c1   : > { %1888 = vmatprep.subr.bf16.mxu0 %v2201_v6  ;;  %1968 = vmatprep.subr.bf16.mxu1 %v2207_v13 }
 0x5c4   : > { %1889 = vmatpush1.bf16.msra.mxu0 %v2200_v7 }
 0x5c5   : > { %1890 = vmatprep.subr.bf16.mxu0 %v2231_v4 }
 0x5c8   : > { %1891 = vmatpush2.bf16.msra.mxu0 %v2230_v5  ;;  %1969 = vmatpush1.bf16.xpose.msra.mxu1 %v2206_v15 }
 0x5c9   : > { %1892 = vmatprep.subr.bf16.mxu0 %v2229_v2  ;;  %1970 = vmatprep.subr.bf16.mxu1 %v2205_v10 }
 0x5cc   : > { %1893 = vmatpush2.bf16.msra.mxu0 %v2228_v3 }
 0x5cd   : > { %1894 = vmatprep.subr.bf16.mxu0 %v2227_v0 }
 0x5d0   : > { %1895 = vmatpush2.bf16.msra.mxu0 %v2226_v1  ;;  %1971 = vmatpush1.bf16.xpose.msra.mxu1 %v2204_v11 }
 0x5d1   : > { %1896 = vmatprep.subr.bf16.mxu0 %v2225_v30  ;;  %1972 = vmatprep.subr.bf16.mxu1 %v2203_v8 }
 0x5d4   : > { %1897 = vmatpush2.bf16.msra.mxu0 %v2224_v31 }
 0x5d5   : > { %1898 = vmatprep.subr.bf16.mxu0 %v2223_v28 }
 0x5d8   : > { %1899 = vmatpush2.bf16.msra.mxu0 %v2222_v29  ;;  %1973 = vmatpush1.bf16.xpose.msra.mxu1 %v2202_v9 }
 0x5d9   : > { %1900 = vmatprep.subr.bf16.mxu0 %v2221_v26  ;;  %1974 = vmatprep.subr.bf16.mxu1 %v2201_v6 }
 0x5dc   : > { %1901 = vmatpush2.bf16.msra.mxu0 %v2220_v27 }
 0x5dd   : > { %1902 = vmatprep.subr.bf16.mxu0 %v2219_v25 }
 0x5e0   : > { %1903 = vmatpush2.bf16.msra.mxu0 %v2218_v40  ;;  %1975 = vmatpush1.bf16.xpose.msra.mxu1 %v2200_v7 }
 0x5e1   : > { %1904 = vmatprep.subr.bf16.mxu0 %v2217_v36  ;;  %1976 = vmatprep.subr.bf16.mxu1 %v2231_v4 }
 0x5e4   : > { %1905 = vmatpush2.bf16.msra.mxu0 %v2216_v61 }
 0x5e7   : > { %1907 = vmatmul.mubr.bf16.vlgmr.msra.gmra.mxu0 %v2358_v20 }
 0x5e8   : > { %1977 = vmatpush2.bf16.xpose.msra.mxu1 %v2230_v5 }
 0x5e9   : > { %1978 = vmatprep.subr.bf16.mxu1 %v2229_v2 }
 0x5f0   : > { %1979 = vmatpush2.bf16.xpose.msra.mxu1 %v2228_v3 }
 0x5f1   : > { %1980 = vmatprep.subr.bf16.mxu1 %v2227_v0 }
 0x5f8   : > { %1981 = vmatpush2.bf16.xpose.msra.mxu1 %v2226_v1 }
 0x5f9   : > { %1982 = vmatprep.subr.bf16.mxu1 %v2225_v30 }
 0x600   : > { %1983 = vmatpush2.bf16.xpose.msra.mxu1 %v2224_v31 }
 0x601   : > { %1984 = vmatprep.subr.bf16.mxu1 %v2223_v28 }
 0x608   : > { %1985 = vmatpush2.bf16.xpose.msra.mxu1 %v2222_v29 }
 0x609   : > { %1986 = vmatprep.subr.bf16.mxu1 %v2221_v26 }
 0x610   : > { %1987 = vmatpush2.bf16.xpose.msra.mxu1 %v2220_v27 }
 0x611   : > { %1988 = vmatprep.subr.bf16.mxu1 %v2219_v25 }
 0x618   : > { %1989 = vmatpush2.bf16.xpose.msra.mxu1 %v2218_v40 }
 0x619   : > { %1990 = vmatprep.subr.bf16.mxu1 %v2217_v36 }
 0x620   : > { %1991 = vmatpush2.bf16.xpose.msra.mxu1 %v2216_v61 }
 0x6a7   : > { %v1908_v19 = vpop.f32.mrf.mxu0 }
 0x6a8   : > { %v1921_v21 = vadd.f32 1.0, %v1908_v19  ;;  %vm1915_vm4 = vcmp.gt.f32.partialorder %v1908_v19, 0.0 }
 0x6a9   : > { %v1910_v18 = vpop.f32.mrf.mxu0 }
 0x6aa   : > { %2361 = vrcp.f32 %v1921_v21  ;;  %v1922_v52 = vadd.f32 1.0, %v1910_v18  ;;  %vm1916_vm6 = vcmp.gt.f32.partialorder %v1910_v18, 0.0 }
 0x6ab   : > { %v1912_v42 = vpop.f32.mrf.mxu0 }
 0x6ac   : > { %2363 = vrcp.f32 %v1922_v52 }
 0x6ad   : > { %v1913_v44 = vpop.f32.mrf.mxu0  ;;  %2365 = vrcp.f32 %v1908_v19 }
 0x6b7   : > { %v2362_v41 = vpop.eup %2361 }
 0x6b8   : > { %v1927_v49 = vrot.slane %v2362_v41, 7 }
 0x6b9   : > { %v2364_v32 = vpop.eup %2363 }
 0x6ba   : > { %v1931_v60 = vmul.f32 %v1927_v49, %v1908_v19  ;;  %v1928_v63 = vrot.slane %v2364_v32, 7  ;;  %v2366_v51 = vpop.eup %2365 }
 0x6bb   : > { %v1919_v48 = vsel %vm1915_vm4, %v2366_v51, 0.0 }
 0x6bc   : > { %2367 = vrsqrt.f32 %v1931_v60  ;;  %v1932_v17 = vmul.f32 %v1928_v63, %v1910_v18  ;;  %vm1933_vm3 = vcmp.gt.f32.partialorder %v1931_v60, 0.0 }
 0x6bd   : > { %2369 = vrcp.f32 %v1910_v18 }
 0x6be   : > { %2371 = vrsqrt.f32 %v1932_v17  ;;  %vm1934_vm5 = vcmp.gt.f32.partialorder %v1932_v17, 0.0 }
 0x6c9   : > { %v2368_v35 = vpop.eup %2367 }
 0x6ca   : > { %v2370_v16 = vpop.eup %2369  ;;  %v1937_v39 = vsel %vm1933_vm3, %v2368_v35, 1.0 }
 0x6cb   : > { %v2372_v50 = vpop.eup %2371  ;;  %v1941_v38 = vrot.slane %v1937_v39, 1  ;;  %v1920_v57 = vsel %vm1916_vm6, %v2370_v16, 0.0 }
 0x6cc   : > { %v1938_v55 = vsel %vm1934_vm5, %v2372_v50, 1.0 }
 0x6cd   : > { %v1942_v33 = vrot.slane %v1938_v55, 1  ;;  %v1945_v54 = vmul.f32 %v1941_v38, %v1919_v48 }
 0x6cf   : > { %v1946_v58 = vmul.f32 %v1942_v33, %v1920_v57  ;;  %v1950_v56 = vrot.slane %v1945_v54, %v1949_v43 }
 0x6d1   : > { %v1954_v62 = vrot.slane %v1946_v58, %v1949_v43  ;;  %v1955_v45 = vmul.f32 %v1950_v56, %v1908_v19 }
 0x6d3   : > { %v1956_v34 = vmul.f32 %v1954_v62, %v1910_v18  ;;  %v1957_v59 = vpack.c.bf16 %v1955_v45, %v1955_v45 }
 0x6d5   : > { %v1958_v37 = vpack.c.bf16 %v1956_v34, %v1956_v34 }
 0x6d7   : > { %1992 = vmatprep.mubr.bf16.mxu1 %v1958_v37 }
 0x6d8   : > { %1993 = vmatmul.mubr.bf16.vlgmr.msra.gmra.mxu1 %v1957_v59 }
 0x798   : > { %v1994_v46 = vpop.f32.mrf.mxu1 }
 0x79a   : > { %v1996_v12 = vpop.f32.mrf.mxu1 }
 0x79b   : > { %v2003_v13 = vcombine.low %v1994_v46, %v1996_v12 }
 0x79c   : > { %v1998_v15 = vpop.f32.mrf.mxu1 }
 0x79d   : > { %v2005_v10 = vadd.f32 %v2003_v13, %v1959_v14 }
 0x79e   : > { %v1999_v11 = vpop.f32.mrf.mxu1 }
 0x79f   : > { %2006 = vst [vmem:[#allocation6] sm:$0xff] %v2005_v10 }
 0x7a0 PF: > { %2010 = sbr.rel (!%p1698_p6) target bundleno = 1975 (0x7b7), region = 80  ;;  %v2012_v8 = vld [vmem:[#allocation4 + $0x40] ss:$8 sm:$0x3] (%p1698_p6)  ;;  %v2018_v9 = vlaneseq (%p1698_p6) }
 0x7a1   : > { %2374 = vrsqrt.f32 (%p1698_p6), %v2012_v8  ;;  %vm2013_vm7 = vcmp.gt.f32.partialorder (%p1698_p6), %v2012_v8, 0.0 }
 0x7a2   : > { %v2019_v6 = vshrl.u32 (%p1698_p6), %v2018_v9, 7 }
 0x7a4   : > { %v2020_v4 = vsub.s32 (%p1698_p6), 0, %v2019_v6  ;;  %v2024_v5 = vsub.s32 (%p1698_p6), 1, %v2019_v6 }
 0x7a6   : > { %v2016_v7 = vld [vmem:[#allocation6] sm:$0xff] }
 0x7a7   : > { %v2029_v3 = vcombine.high %v2016_v7, %v2016_v7 }
 0x7ae   : > { %v2375_v2 = vpop.eup %2374 }
 0x7af   : > { %v2015_v0 = vsel %vm2013_vm7, %v2375_v2, 0.0 }
 0x7b0   : > { %v2021_v1 = vrot.slane %v2015_v0, %v2020_v4  ;;  %v2025_v30 = vrot.slane %v2015_v0, %v2024_v5 }
 0x7b2   : > { %v2031_v31 = vmul.f32 %v2021_v1, %v2016_v7  ;;  %v2032_v28 = vmul.f32 %v2029_v3, %v2025_v30 }
 0x7b4   : > { %v2035_v29 = vcombine.low %v2031_v31, %v2032_v28 }
 0x7b6   : > { %2037 = vst [vmem:[%s3021_s10] sm:$0xff] %v2035_v29 }
 0x7b7 PF: > { %s20_s15 = sadd.s32 1, %s2398_s15   ;;  %s3036_s13 = smov %s2394_s14 }
 0x7b8   : > { %p17_p8 = scmp.ge.s32.totalorder %s20_s15, 4   ;;  %s3037_s14 = smov %s3039_s16 }
 0x7ba   :  { %19 = sbr.rel (!%p17_p8) target bundleno = 2 (0x2), region = 111 }

</bundles_post_ra>
